<compile_context>
chip_gen: v7x
topology: tpu7x:2x2x1
jax: 0.10.0
libtpu: 0.0.40
codegen_flags: <defaults>
</compile_context>

<pallas_src>
import functools

import jax
import jax.numpy as jnp
from jax.experimental import pallas as pl
from jax.experimental.pallas import tpu as pltpu


DEFAULT_TILE_B = 512   # rows per grid step (MXU M dim / pipelining unit)
LARGE_TILE_B = 1024    # used automatically when the batch is very large
OUT_LANES = 128        # lane-dense padded output width; column 0 is the value
H3_PAD = 384           # 300 -> 384 (multiple of 128) for lane-dense FC3/FC4


def _round_up(x, m):
    return ((x + m - 1) // m) * m


def _critic_kernel(obs_ref, acts_ref,
                   w1_ref, b1_ref,
                   w2h_ref, w2a_ref, b2_ref,
                   w3_ref, b3_ref,
                   w4_ref, b4_ref,
                   out_ref):
    # obs/acts arrive already in bf16 (cast in the wrapper); MXU accumulates f32.
    obs = obs_ref[...]
    acts = acts_ref[...]

    # FC1 + ReLU (f32 bias add / ReLU)
    h1 = jnp.dot(obs, w1_ref[...], preferred_element_type=jnp.float32) + b1_ref[...]
    h1 = jnp.maximum(h1, 0.0)

    # FC2 over concat([h1, acts], 1) == h1 @ W2[:1024] + acts @ W2[1024:] + b2
    h2 = (jnp.dot(h1.astype(jnp.bfloat16), w2h_ref[...],
                  preferred_element_type=jnp.float32)
          + jnp.dot(acts, w2a_ref[...], preferred_element_type=jnp.float32)
          + b2_ref[...])
    h2 = jnp.maximum(h2, 0.0)

    # FC3 + ReLU (output padded 300 -> 384, padded columns are exactly 0)
    h3 = jnp.dot(h2.astype(jnp.bfloat16), w3_ref[...],
                 preferred_element_type=jnp.float32) + b3_ref[...]
    h3 = jnp.maximum(h3, 0.0)

    # FC4, padded to 128 lanes for an unmasked lane-dense store (bf16 slab).
    out = jnp.dot(h3.astype(jnp.bfloat16), w4_ref[...],
                  preferred_element_type=jnp.float32) + b4_ref[...]
    out_ref[...] = out.astype(out_ref.dtype)


def prepare_params(params):
    """One-time packing: split W2, reshape biases, pad FC3/FC4, cast weights bf16."""
    w1, b1, w2, b2, w3, b3, w4, b4 = params
    h1_dim = w1.shape[1]
    w2h = w2[:h1_dim, :]                         # (1024, 512)
    w2a = w2[h1_dim:, :]                         # (dim_action*n_agent, 512)

    # Zero-pad hidden dim 300 -> 384 (lane-dense FC3 output / FC4 K dim).
    h3 = w3.shape[1]
    w3p = jnp.zeros((w3.shape[0], H3_PAD), jnp.float32).at[:, :h3].set(w3)
    b3p = jnp.zeros((1, H3_PAD), jnp.float32).at[:, :h3].set(b3.reshape(1, -1))

    # Zero-pad FC4: rows 300 -> 384, cols 1 -> 128 (lane-dense store).
    w4p = (jnp.zeros((H3_PAD, OUT_LANES), jnp.float32)
           .at[:h3, :w4.shape[1]].set(w4))
    b4p = jnp.zeros((1, OUT_LANES), jnp.float32).at[:, :b4.shape[0]].set(b4)

    bf = lambda w: w.astype(jnp.bfloat16)
    return (bf(w1), b1.reshape(1, -1).astype(jnp.float32),
            bf(w2h), bf(w2a), b2.reshape(1, -1).astype(jnp.float32),
            bf(w3p), b3p,
            bf(w4p), b4p)


@functools.partial(jax.jit, static_argnames=("tile_b",))
def critic_forward(obs, acts, prepared, tile_b=DEFAULT_TILE_B):
    """obs: (B, dim_state) f32, acts: (B, dim_action*n_agent) f32 -> (B, 1) f32."""
    w1, b1, w2h, w2a, b2, w3, b3, w4, b4 = prepared
    B, ds = obs.shape
    da = acts.shape[1]

    # Tile cap: 512 by default, 1024 for very large batches.
    cap = max(tile_b, LARGE_TILE_B) if B >= 4 * LARGE_TILE_B else tile_b
    # Ensure >= 2 grid steps whenever possible so v7x's 2 TCs both get work.
    tb = max(8, min(cap, _round_up(pl.cdiv(B, 2), 8)))
    b_pad = _round_up(B, tb)

    # Cast inputs to bf16 in the wrapper: halves input DMA, removes in-kernel casts.
    obs = obs.astype(jnp.bfloat16)
    acts = acts.astype(jnp.bfloat16)
    if b_pad != B:
        obs = jnp.pad(obs, ((0, b_pad - B), (0, 0)))
        acts = jnp.pad(acts, ((0, b_pad - B), (0, 0)))

    grid = (b_pad // tb,)

    def batch_spec(feat):
        return pl.BlockSpec((tb, feat), lambda i: (i, 0))

    def resident(arr):
        # Whole array, constant block index -> fetched once, VMEM-resident.
        # Single-buffered: no point double-buffering a block that never changes.
        return pl.BlockSpec(arr.shape, lambda i: (0, 0),
                            pipeline_mode=pl.Buffered(1))

    weight_bytes = sum(int(x.size) * x.dtype.itemsize
                       for x in (w1, b1, w2h, w2a, b2, w3, b3, w4, b4))
    flops = 2 * b_pad * (ds * w1.shape[1]
                         + (w1.shape[1] + da) * w2h.shape[1]
                         + w2h.shape[1] * w3.shape[1]
                         + w3.shape[1] * OUT_LANES)
    cost = pl.CostEstimate(
        flops=flops,
        transcendentals=0,
        bytes_accessed=weight_bytes + b_pad * (ds + da + OUT_LANES) * 2)

    out_full = pl.pallas_call(
        _critic_kernel,
        out_shape=jax.ShapeDtypeStruct((b_pad, OUT_LANES), jnp.bfloat16),
        grid=grid,
        in_specs=[batch_spec(ds), batch_spec(da),
                  resident(w1), resident(b1),
                  resident(w2h), resident(w2a), resident(b2),
                  resident(w3), resident(b3),
                  resident(w4), resident(b4)],
        out_specs=pl.BlockSpec((tb, OUT_LANES), lambda i: (i, 0)),
        compiler_params=pltpu.CompilerParams(
            dimension_semantics=("parallel",),
            vmem_limit_bytes=32 * 1024 * 1024),
        cost_estimate=cost,
    )(obs, acts, w1, b1, w2h, w2a, b2, w3, b3, w4, b4)

    return out_full[:B, :1].astype(jnp.float32)


def init_params(key, n_agent, dim_state, dim_action):
    """Deterministic synthetic parameters matching the PyTorch module shapes."""
    dims = [
        (dim_state, 1024),
        (1024 + dim_action * n_agent, 512),
        (512, 300),
        (300, 1),
    ]
    params = []
    for din, dout in dims:
        kw, kb, key = jax.random.split(key, 3)
        scale = 1.0 / jnp.sqrt(jnp.float32(din))
        w = jax.random.uniform(kw, (din, dout), jnp.float32, -scale, scale)
        b = jax.random.uniform(kb, (dout,), jnp.float32, -scale, scale)
        params += [w, b]
    return tuple(params)


def critic_ref(obs, acts, params):
    """Pure-JAX reference mirroring the PyTorch forward."""
    w1, b1, w2, b2, w3, b3, w4, b4 = params
    h = jax.nn.relu(obs @ w1 + b1)
    combined = jnp.concatenate([h, acts], axis=1)
    h = jax.nn.relu(combined @ w2 + b2)
    h = jax.nn.relu(h @ w3 + b3)
    return h @ w4 + b4


def quantize_weights_like_kernel(params):
    """bf16-round the weights (as the kernel stores them) for the reference."""
    w1, b1, w2, b2, w3, b3, w4, b4 = params
    q = lambda w: w.astype(jnp.bfloat16).astype(jnp.float32)
    return (q(w1), b1, q(w2), b2, q(w3), b3, q(w4), b4)


if __name__ == "__main__":
    n_agent = 2
    dim_state = 32
    dim_action = 4
    batch = 8

    key = jax.random.PRNGKey(0)
    k_obs, k_act, k_par = jax.random.split(key, 3)
    obs = jax.random.normal(k_obs, (batch, dim_state), jnp.float32)
    acts = jax.random.normal(k_act, (batch, dim_action * n_agent), jnp.float32)
    params = init_params(k_par, n_agent, dim_state, dim_action)
    prepared = prepare_params(params)

    out = critic_forward(obs, acts, prepared)
    out = jax.block_until_ready(out)

    # Reference uses the same bf16-rounded weights (f32 activations); remaining
    # delta comes from bf16 activation/input casts and the bf16 output slab.
    ref = critic_ref(obs, acts, quantize_weights_like_kernel(params))
    assert out.shape == (batch, 1)
    assert jnp.allclose(out, ref, atol=2.5e-2, rtol=2.5e-2), (out, ref)
    print("KERNEL_OK")
</pallas_src>

<mosaic_0001>
module attributes {stable_mosaic.version = 11 : i64} {
  func.func @_critic_kernel(%arg0: i32, %arg1: memref<8x32xbf16, #tpu.memory_space<vmem>>, %arg2: memref<8x8xbf16, #tpu.memory_space<vmem>>, %arg3: memref<32x1024xbf16, #tpu.memory_space<vmem>>, %arg4: memref<1x1024xf32, #tpu.memory_space<vmem>>, %arg5: memref<1024x512xbf16, #tpu.memory_space<vmem>>, %arg6: memref<8x512xbf16, #tpu.memory_space<vmem>>, %arg7: memref<1x512xf32, #tpu.memory_space<vmem>>, %arg8: memref<512x384xbf16, #tpu.memory_space<vmem>>, %arg9: memref<1x384xf32, #tpu.memory_space<vmem>>, %arg10: memref<384x128xbf16, #tpu.memory_space<vmem>>, %arg11: memref<1x128xf32, #tpu.memory_space<vmem>>, %arg12: memref<8x128xbf16, #tpu.memory_space<vmem>>) attributes {dimension_semantics = [#tpu.dimension_semantics<parallel>], iteration_bounds = array<i64: 1>, scalar_prefetch = 0 : i64, scratch_operands = 0 : i64, tpu.core_type = #tpu.core_type<tc>, window_params = [{transform_indices = @transform_0, window_bounds = array<i64: 8, 32>}, {transform_indices = @transform_1, window_bounds = array<i64: 8, 8>}, {pipeline_mode = #tpu.pipeline_mode<synchronous>, transform_indices = @transform_2, window_bounds = array<i64: 32, 1024>}, {pipeline_mode = #tpu.pipeline_mode<synchronous>, transform_indices = @transform_3, window_bounds = array<i64: 1, 1024>}, {pipeline_mode = #tpu.pipeline_mode<synchronous>, transform_indices = @transform_4, window_bounds = array<i64: 1024, 512>}, {pipeline_mode = #tpu.pipeline_mode<synchronous>, transform_indices = @transform_5, window_bounds = array<i64: 8, 512>}, {pipeline_mode = #tpu.pipeline_mode<synchronous>, transform_indices = @transform_6, window_bounds = array<i64: 1, 512>}, {pipeline_mode = #tpu.pipeline_mode<synchronous>, transform_indices = @transform_7, window_bounds = array<i64: 512, 384>}, {pipeline_mode = #tpu.pipeline_mode<synchronous>, transform_indices = @transform_8, window_bounds = array<i64: 1, 384>}, {pipeline_mode = #tpu.pipeline_mode<synchronous>, transform_indices = @transform_9, window_bounds = array<i64: 384, 128>}, {pipeline_mode = #tpu.pipeline_mode<synchronous>, transform_indices = @transform_10, window_bounds = array<i64: 1, 128>}, {transform_indices = @transform_11, window_bounds = array<i64: 8, 128>}]} {
    %c0 = arith.constant 0 : index
    %c0_0 = arith.constant 0 : index
    %0 = vector.load %arg1[%c0, %c0_0] : memref<8x32xbf16, #tpu.memory_space<vmem>>, vector<8x32xbf16>
    %c0_1 = arith.constant 0 : index
    %c0_2 = arith.constant 0 : index
    %1 = vector.load %arg2[%c0_1, %c0_2] : memref<8x8xbf16, #tpu.memory_space<vmem>>, vector<8x8xbf16>
    %c0_3 = arith.constant 0 : index
    %c0_4 = arith.constant 0 : index
    %2 = vector.load %arg3[%c0_3, %c0_4] : memref<32x1024xbf16, #tpu.memory_space<vmem>>, vector<32x1024xbf16>
    %cst = arith.constant dense<0.000000e+00> : vector<8x1024xf32>
    %3 = tpu.matmul %0, %2, %cst {dimension_numbers = #tpu.dot_dimension_numbers<[1], [0], [0], [1], [0, 0, 1, 1], [], []>} : vector<8x32xbf16>, vector<32x1024xbf16>, vector<8x1024xf32> -> vector<8x1024xf32>
    %c0_5 = arith.constant 0 : index
    %c0_6 = arith.constant 0 : index
    %4 = vector.load %arg4[%c0_5, %c0_6] : memref<1x1024xf32, #tpu.memory_space<vmem>>, vector<1x1024xf32>
    %5 = vector.broadcast %4 : vector<1x1024xf32> to vector<8x1024xf32>
    %6 = arith.addf %3, %5 : vector<8x1024xf32>
    %cst_7 = arith.constant 0.000000e+00 : f32
    %7 = vector.broadcast %cst_7 : f32 to vector<8x1024xf32>
    %8 = arith.maximumf %6, %7 : vector<8x1024xf32>
    %9 = arith.truncf %8 : vector<8x1024xf32> to vector<8x1024xbf16>
    %c0_8 = arith.constant 0 : index
    %c0_9 = arith.constant 0 : index
    %10 = vector.load %arg5[%c0_8, %c0_9] : memref<1024x512xbf16, #tpu.memory_space<vmem>>, vector<1024x512xbf16>
    %cst_10 = arith.constant dense<0.000000e+00> : vector<8x512xf32>
    %11 = tpu.matmul %9, %10, %cst_10 {dimension_numbers = #tpu.dot_dimension_numbers<[1], [0], [0], [1], [0, 0, 1, 1], [], []>} : vector<8x1024xbf16>, vector<1024x512xbf16>, vector<8x512xf32> -> vector<8x512xf32>
    %c0_11 = arith.constant 0 : index
    %c0_12 = arith.constant 0 : index
    %12 = vector.load %arg6[%c0_11, %c0_12] : memref<8x512xbf16, #tpu.memory_space<vmem>>, vector<8x512xbf16>
    %cst_13 = arith.constant dense<0.000000e+00> : vector<8x512xf32>
    %13 = tpu.matmul %1, %12, %cst_13 {dimension_numbers = #tpu.dot_dimension_numbers<[1], [0], [0], [1], [0, 0, 1, 1], [], []>} : vector<8x8xbf16>, vector<8x512xbf16>, vector<8x512xf32> -> vector<8x512xf32>
    %14 = arith.addf %11, %13 : vector<8x512xf32>
    %c0_14 = arith.constant 0 : index
    %c0_15 = arith.constant 0 : index
    %15 = vector.load %arg7[%c0_14, %c0_15] : memref<1x512xf32, #tpu.memory_space<vmem>>, vector<1x512xf32>
    %16 = vector.broadcast %15 : vector<1x512xf32> to vector<8x512xf32>
    %17 = arith.addf %14, %16 : vector<8x512xf32>
    %cst_16 = arith.constant 0.000000e+00 : f32
    %18 = vector.broadcast %cst_16 : f32 to vector<8x512xf32>
    %19 = arith.maximumf %17, %18 : vector<8x512xf32>
    %20 = arith.truncf %19 : vector<8x512xf32> to vector<8x512xbf16>
    %c0_17 = arith.constant 0 : index
    %c0_18 = arith.constant 0 : index
    %21 = vector.load %arg8[%c0_17, %c0_18] : memref<512x384xbf16, #tpu.memory_space<vmem>>, vector<512x384xbf16>
    %cst_19 = arith.constant dense<0.000000e+00> : vector<8x384xf32>
    %22 = tpu.matmul %20, %21, %cst_19 {dimension_numbers = #tpu.dot_dimension_numbers<[1], [0], [0], [1], [0, 0, 1, 1], [], []>} : vector<8x512xbf16>, vector<512x384xbf16>, vector<8x384xf32> -> vector<8x384xf32>
    %c0_20 = arith.constant 0 : index
    %c0_21 = arith.constant 0 : index
    %23 = vector.load %arg9[%c0_20, %c0_21] : memref<1x384xf32, #tpu.memory_space<vmem>>, vector<1x384xf32>
    %24 = vector.broadcast %23 : vector<1x384xf32> to vector<8x384xf32>
    %25 = arith.addf %22, %24 : vector<8x384xf32>
    %cst_22 = arith.constant 0.000000e+00 : f32
    %26 = vector.broadcast %cst_22 : f32 to vector<8x384xf32>
    %27 = arith.maximumf %25, %26 : vector<8x384xf32>
    %28 = arith.truncf %27 : vector<8x384xf32> to vector<8x384xbf16>
    %c0_23 = arith.constant 0 : index
    %c0_24 = arith.constant 0 : index
    %29 = vector.load %arg10[%c0_23, %c0_24] : memref<384x128xbf16, #tpu.memory_space<vmem>>, vector<384x128xbf16>
    %cst_25 = arith.constant dense<0.000000e+00> : vector<8x128xf32>
    %30 = tpu.matmul %28, %29, %cst_25 {dimension_numbers = #tpu.dot_dimension_numbers<[1], [0], [0], [1], [0, 0, 1, 1], [], []>} : vector<8x384xbf16>, vector<384x128xbf16>, vector<8x128xf32> -> vector<8x128xf32>
    %c0_26 = arith.constant 0 : index
    %c0_27 = arith.constant 0 : index
    %31 = vector.load %arg11[%c0_26, %c0_27] : memref<1x128xf32, #tpu.memory_space<vmem>>, vector<1x128xf32>
    %32 = vector.broadcast %31 : vector<1x128xf32> to vector<8x128xf32>
    %33 = arith.addf %30, %32 : vector<8x128xf32>
    %34 = arith.truncf %33 : vector<8x128xf32> to vector<8x128xbf16>
    %c0_28 = arith.constant 0 : index
    %c0_29 = arith.constant 0 : index
    %35 = vector.load %arg12[%c0_28, %c0_29] : memref<8x128xbf16, #tpu.memory_space<vmem>>, vector<8x128xbf16>
    tpu.vector_store %arg12[%c0_28, %c0_29], %34 {strides = array<i32>} : memref<8x128xbf16, #tpu.memory_space<vmem>>, vector<8x128xbf16>,
    return
  }
  func.func @transform_0(%arg0: i32) -> (i32, i32) {
    %c0_i32 = arith.constant 0 : i32
    %c0_i32_0 = arith.constant 0 : i32
    return %arg0, %c0_i32 : i32, i32
  }
  func.func @transform_1(%arg0: i32) -> (i32, i32) {
    %c0_i32 = arith.constant 0 : i32
    %c0_i32_0 = arith.constant 0 : i32
    return %arg0, %c0_i32 : i32, i32
  }
  func.func @transform_2(%arg0: i32) -> (i32, i32) {
    %c0_i32 = arith.constant 0 : i32
    %c0_i32_0 = arith.constant 0 : i32
    %c0_i32_1 = arith.constant 0 : i32
    return %c0_i32, %c0_i32_0 : i32, i32
  }
  func.func @transform_3(%arg0: i32) -> (i32, i32) {
    %c0_i32 = arith.constant 0 : i32
    %c0_i32_0 = arith.constant 0 : i32
    %c0_i32_1 = arith.constant 0 : i32
    return %c0_i32, %c0_i32_0 : i32, i32
  }
  func.func @transform_4(%arg0: i32) -> (i32, i32) {
    %c0_i32 = arith.constant 0 : i32
    %c0_i32_0 = arith.constant 0 : i32
    %c0_i32_1 = arith.constant 0 : i32
    return %c0_i32, %c0_i32_0 : i32, i32
  }
  func.func @transform_5(%arg0: i32) -> (i32, i32) {
    %c0_i32 = arith.constant 0 : i32
    %c0_i32_0 = arith.constant 0 : i32
    %c0_i32_1 = arith.constant 0 : i32
    return %c0_i32, %c0_i32_0 : i32, i32
  }
  func.func @transform_6(%arg0: i32) -> (i32, i32) {
    %c0_i32 = arith.constant 0 : i32
    %c0_i32_0 = arith.constant 0 : i32
    %c0_i32_1 = arith.constant 0 : i32
    return %c0_i32, %c0_i32_0 : i32, i32
  }
  func.func @transform_7(%arg0: i32) -> (i32, i32) {
    %c0_i32 = arith.constant 0 : i32
    %c0_i32_0 = arith.constant 0 : i32
    %c0_i32_1 = arith.constant 0 : i32
    return %c0_i32, %c0_i32_0 : i32, i32
  }
  func.func @transform_8(%arg0: i32) -> (i32, i32) {
    %c0_i32 = arith.constant 0 : i32
    %c0_i32_0 = arith.constant 0 : i32
    %c0_i32_1 = arith.constant 0 : i32
    return %c0_i32, %c0_i32_0 : i32, i32
  }
  func.func @transform_9(%arg0: i32) -> (i32, i32) {
    %c0_i32 = arith.constant 0 : i32
    %c0_i32_0 = arith.constant 0 : i32
    %c0_i32_1 = arith.constant 0 : i32
    return %c0_i32, %c0_i32_0 : i32, i32
  }
  func.func @transform_10(%arg0: i32) -> (i32, i32) {
    %c0_i32 = arith.constant 0 : i32
    %c0_i32_0 = arith.constant 0 : i32
    %c0_i32_1 = arith.constant 0 : i32
    return %c0_i32, %c0_i32_0 : i32, i32
  }
  func.func @transform_11(%arg0: i32) -> (i32, i32) {
    %c0_i32 = arith.constant 0 : i32
    %c0_i32_0 = arith.constant 0 : i32
    return %arg0, %c0_i32 : i32, i32
  }
}

</mosaic_0001>

<bundles_post_ra>
// kernel: critic_forward.1
= control target key start
LH: loop header
LB: loop body
LE: loop exit
PB: predicated region body
PF: predicated region fallthrough
CT: control target
= control target key end

     0   :  { %16 = vsyncpa [#allocation3], 0  ;;  %s4950_s0 = inlined_call_operand.vmem [shape: bf16[8,32], index: 0, kind: input, shape index: {}]   ;;  %s4951_s1 = inlined_call_operand.vmem [shape: bf16[8,8], index: 1, kind: input, shape index: {}]   ;;  %s4952_s2 = inlined_call_operand.hbm [shape: bf16[32,1024], index: 2, kind: input, shape index: {}]   ;;  %s4953_s3 = inlined_call_operand.vmem [shape: f32[1,1024], index: 3, kind: input, shape index: {}]   ;;  %s4954_s4 = inlined_call_operand.hbm [shape: bf16[1024,512], index: 4, kind: input, shape index: {}]   ;;  %s4955_s5 = inlined_call_operand.vmem [shape: bf16[8,512], index: 5, kind: input, shape index: {}]   ;;  %s4956_s6 = inlined_call_operand.vmem [shape: f32[1,512], index: 6, kind: input, shape index: {}]   ;;  %s4957_s7 = inlined_call_operand.hbm [shape: bf16[512,384], index: 7, kind: input, shape index: {}]   ;;  %s4958_s8 = inlined_call_operand.vmem [shape: f32[1,384], index: 8, kind: input, shape index: {}]   ;;  %s4959_s9 = inlined_call_operand.hbm [shape: bf16[384,128], index: 9, kind: input, shape index: {}]   ;;  %s4960_s10 = inlined_call_operand.vmem [shape: f32[1,128], index: 10, kind: input, shape index: {}]   ;;  %s4961_s11 = inlined_call_operand.vmem [shape: bf16[8,128], index: 11, kind: output, shape index: {}]  }
   0x1   :  { %17 = vsyncpa [#allocation5], 0 }
   0x2   :  { %18 = vsyncpa [#allocation8], 0  ;;  %s4695_s17 = smov [#allocation4]   ;;  %s4601_s21 = scalar_lea.hbm %s4954_s4, 32768 }
   0x3   :  { %s42_s18 = sshll.u32 %s4695_s17, 4  ;;  %p4602_p0 = scmp.ne.s32.totalorder %s4954_s4, %s4601_s21  ;;  %s43_s18 = int_to_ptr.vmem [resolvable:$true] %s42_s18 }
   0x4   :  { %p4605_p1 = scmp.lt.u32.totalorder %s4601_s21, %s4954_s4 }
   0x6   :  { %p4607_p2 = pnand %p4605_p1, %p4602_p0 }
   0x8   :  { %4610 = shalt.err (!%p4607_p2)
}
   0x9   :  { %s4611_s26 = scalar_lea.vmem %s43_s18, 32768  ;;  %p4616_p4 = scmp.lt.s32.totalorder %s43_s18, %s43_s18 }
   0xa   :  { %p4612_p3 = scmp.ne.s32.totalorder %s43_s18, %s4611_s26  ;;  %p4617_p5 = scmp.lt.s32.totalorder %s4611_s26, %s4611_s26 }
   0xc   :  { %p4618_p6 = por %p4617_p5, %p4616_p4 }
   0xe   :  { %p4619_p7 = pnand %p4618_p6, %p4612_p3 }
  0x10   :  { %4622 = shalt.err (!%p4619_p7)
}
  0x11   :  { %s4696_s27 = smov 256   ;;  %s4697_s28 = smov 16  }
  0x12   :  { %48 = dma.hbm_to_vmem [thread:$0]  %s4954_s4, 32768, %s43_s18, [#allocation5], %s4696_s27, %s4696_s27, %s4697_s28  }
  0x13   :  { %s4698_s12 = smov [#allocation2]   ;;  %s4623_s16 = scalar_lea.hbm %s4952_s2, 2048 }
  0x14   :  { %s28_s13 = sshll.u32 %s4698_s12, 4  ;;  %p4624_p8 = scmp.ne.s32.totalorder %s4952_s2, %s4623_s16  ;;  %s29_s13 = int_to_ptr.vmem [resolvable:$true] %s28_s13 }
  0x15   :  { %p4627_p9 = scmp.lt.u32.totalorder %s4623_s16, %s4952_s2 }
  0x17   :  { %p4629_p10 = pnand %p4627_p9, %p4624_p8 }
  0x19   :  { %4632 = shalt.err (!%p4629_p10)
}
  0x1a   :  { %s4633_s22 = scalar_lea.vmem %s29_s13, 2048  ;;  %p4638_p12 = scmp.lt.s32.totalorder %s29_s13, %s29_s13 }
  0x1b   :  { %p4634_p11 = scmp.ne.s32.totalorder %s29_s13, %s4633_s22  ;;  %p4639_p13 = scmp.lt.s32.totalorder %s4633_s22, %s4633_s22 }
  0x1d   :  { %p4640_p0 = por %p4639_p13, %p4638_p12 }
  0x1f   :  { %p4641_p1 = pnand %p4640_p0, %p4634_p11 }
  0x21   :  { %4644 = shalt.err (!%p4641_p1)
}
  0x22   :  { %s4699_s4 = smov 512   ;;  %s4700_s18 = smov 32  }
  0x23   :  { %34 = dma.hbm_to_vmem [thread:$0]  %s4952_s2, 2048, %s29_s13, [#allocation3], %s4699_s4, %s4699_s4, %s4700_s18  }
  0x24   :  { %s4701_s25 = smov [#allocation6]   ;;  %s4645_s29 = scalar_lea.hbm %s4957_s7, 12288 }
  0x25   :  { %s58_s26 = sshll.u32 %s4701_s25, 4  ;;  %p4646_p2 = scmp.ne.s32.totalorder %s4957_s7, %s4645_s29  ;;  %s59_s26 = int_to_ptr.vmem [resolvable:$true] %s58_s26 }
  0x26   :  { %p4649_p3 = scmp.lt.u32.totalorder %s4645_s29, %s4957_s7 }
  0x28   :  { %p4651_p4 = pnand %p4649_p3, %p4646_p2 }
  0x2a   :  { %4654 = shalt.err (!%p4651_p4)
}
  0x2b   :  { %s4655_s16 = scalar_lea.vmem %s59_s26, 12288  ;;  %p4660_p6 = scmp.lt.s32.totalorder %s59_s26, %s59_s26 }
  0x2c   :  { %p4656_p5 = scmp.ne.s32.totalorder %s59_s26, %s4655_s16  ;;  %p4661_p7 = scmp.lt.s32.totalorder %s4655_s16, %s4655_s16 }
  0x2e   :  { %p4662_p8 = por %p4661_p7, %p4660_p6 }
  0x30   :  { %p4663_p9 = pnand %p4662_p8, %p4656_p5 }
  0x32   :  { %4666 = shalt.err (!%p4663_p9)
}
  0x33   :  { %s4702_s2 = smov 192   ;;  %s4703_s13 = smov 12  }
  0x34   :  { %64 = dma.hbm_to_vmem [thread:$0]  %s4957_s7, 12288, %s59_s26, [#allocation5], %s4702_s2, %s4702_s2, %s4703_s13  }
  0x35   :  { %s4704_s20 = smov [#allocation7]   ;;  %s4667_s18 = scalar_lea.hbm %s4959_s9, 3072 }
  0x36   :  { %s72_s21 = sshll.u32 %s4704_s20, 4  ;;  %p4668_p10 = scmp.ne.s32.totalorder %s4959_s9, %s4667_s18  ;;  %s73_s21 = int_to_ptr.vmem [resolvable:$true] %s72_s21 }
  0x37   :  { %p4671_p11 = scmp.lt.u32.totalorder %s4667_s18, %s4959_s9 }
  0x39   :  { %p4673_p12 = pnand %p4671_p11, %p4668_p10 }
  0x3b   :  { %4676 = shalt.err (!%p4673_p12)
}
  0x3c   :  { %s4677_s28 = scalar_lea.vmem %s73_s21, 3072  ;;  %p4682_p0 = scmp.lt.s32.totalorder %s73_s21, %s73_s21 }
  0x3d   :  { %p4678_p13 = scmp.ne.s32.totalorder %s73_s21, %s4677_s28  ;;  %p4683_p1 = scmp.lt.s32.totalorder %s4677_s28, %s4677_s28 }
  0x3f   :  { %p4684_p2 = por %p4683_p1, %p4682_p0 }
  0x41   :  { %p4685_p3 = pnand %p4684_p2, %p4678_p13 }
  0x43   :  { %4688 = shalt.err (!%p4685_p3)
}
  0x44   :  { %s4705_s7 = smov 64   ;;  %s4706_s26 = smov 4  }
  0x45   :  { %78 = dma.hbm_to_vmem [thread:$0]  %s4959_s9, 3072, %s73_s21, [#allocation8], %s4705_s7, %s4705_s7, %s4706_s26  }
  0x46   :  { %4689 = dma.done.wait [#allocation3], 2048  }
  0x47   :  { %4690 = vsyncadd [#allocation3], 4294965248 }
  0x48   :  { %4691 = dma.done.wait [#allocation5], 45056  }
  0x49   :  { %4692 = vsyncadd [#allocation5], 4294922240 }
  0x4a   :  { %4693 = dma.done.wait [#allocation8], 3072  }
  0x4b   :  { %4694 = vsyncadd [#allocation8], 4294964224  ;;  %v4707_v0 = vmov 0   ;;  %v96_v1 = vld [vmem:[#allocation2] sm:$0xff]  ;;  %v97_v3 = vld [vmem:[#allocation2 + $0x8] sm:$0xff]  ;;  %vm234_vm0 = vcmask 261120  }
  0x4c   :  { %270 = vmatprep.mubr.bf16.mxu0 %v4707_v0  ;;  %311 = vmatprep.mubr.bf16.mxu1 %v4707_v0  ;;  %v100_v2 = vld [vmem:[#allocation2 + $0x20] sm:$0xff]  ;;  %v101_v5 = vld [vmem:[#allocation2 + $0x28] sm:$0xff]  ;;  %v98_v15 = vld [vmem:[#allocation2 + $0x10] sm:$0xff]  ;;  %vm690_vm1 = vcmask 1043456   ;;  %vm686_vm2 = vcmask 64512   ;;  %vm4709_vm3 = vmmov 0  }
  0x4d   :  { %v3541_v4 = vcombine.high %v96_v1, %v100_v2  ;;  %v3540_v6 = vcombine.low %v96_v1, %v100_v2  ;;  %v104_v7 = vld [vmem:[#allocation2 + $0x40] sm:$0xff]  ;;  %v3543_v9 = vcombine.high %v97_v3, %v101_v5  ;;  %v3542_v10 = vcombine.low %v97_v3, %v101_v5  ;;  %v105_v12 = vld [vmem:[#allocation2 + $0x48] sm:$0xff]  ;;  %v102_v16 = vld [vmem:[#allocation2 + $0x30] sm:$0xff] }
  0x4e   :  { %v108_v8 = vld [vmem:[#allocation2 + $0x60] sm:$0xff]  ;;  %v109_v13 = vld [vmem:[#allocation2 + $0x68] sm:$0xff]  ;;  %v99_v17 = vld [vmem:[#allocation2 + $0x18] sm:$0xff]  ;;  %v3545_v21 = vcombine.high %v98_v15, %v102_v16  ;;  %v3544_v28 = vcombine.low %v98_v15, %v102_v16 }
  0x4f   :  { %v3549_v11 = vcombine.high %v104_v7, %v108_v8  ;;  %238 = vmatprep.subr.bf16.mxu0 %v3541_v4  ;;  %v3551_v14 = vcombine.high %v105_v12, %v109_v13  ;;  %279 = vmatprep.subr.bf16.mxu1 %v3543_v9  ;;  %v3548_v18 = vcombine.low %v104_v7, %v108_v8  ;;  %v103_v19 = vld [vmem:[#allocation2 + $0x38] sm:$0xff]  ;;  %v106_v23 = vld [vmem:[#allocation2 + $0x50] sm:$0xff] }
  0x50   :  { %239 = vmatpush1.bf16.msra.mxu0 %v3540_v6  ;;  %280 = vmatpush1.bf16.msra.mxu1 %v3542_v10  ;;  %v3550_v20 = vcombine.low %v105_v12, %v109_v13  ;;  %v3547_v22 = vcombine.high %v99_v17, %v103_v19  ;;  %v110_v24 = vld [vmem:[#allocation2 + $0x70] sm:$0xff]  ;;  %v107_v25 = vld [vmem:[#allocation2 + $0x58] sm:$0xff]  ;;  %v3546_v29 = vcombine.low %v99_v17, %v103_v19 }
  0x51   :  { %240 = vmatprep.subr.bf16.mxu0 %v3549_v11  ;;  %281 = vmatprep.subr.bf16.mxu1 %v3551_v14  ;;  %v111_v26 = vld [vmem:[#allocation2 + $0x78] sm:$0xff]  ;;  %v94_v27 = vld [vmem:[%s4950_s0] sm:$0xf]  ;;  %v3553_v30 = vcombine.high %v106_v23, %v110_v24  ;;  %v3552_v34 = vcombine.low %v106_v23, %v110_v24  ;;  %v4067_v42 = vld [vmem:[#allocation4 + $0x4] ss:$16 sps:$4 sm:$0xff]  }
  0x52   :  { %v3555_v31 = vcombine.high %v107_v25, %v111_v26  ;;  %v674_v32 = vld [vmem:[%s4955_s5] sm:$0xff]  ;;  %v675_v33 = vld [vmem:[%s4955_s5 + $0x8] sm:$0xff]  ;;  %v3554_v35 = vcombine.low %v107_v25, %v111_v26 }
  0x53   :  { %v3561_v36 = vcombine.high %v674_v32, %v674_v32  ;;  %v3560_v37 = vcombine.low %v674_v32, %v674_v32  ;;  %v3563_v38 = vcombine.high %v675_v33, %v675_v33  ;;  %v3562_v39 = vcombine.low %v675_v33, %v675_v33  ;;  %v4070_v43 = vld [vmem:[#allocation4 + $0x204] ss:$16 sps:$4 sm:$0xff]   ;;  %v95_v44 = vld [vmem:[%s4951_s1] sm:$0xf] }
  0x54   :  { %241 = vmatpush1.bf16.msra.mxu0 %v3548_v18  ;;  %282 = vmatpush1.bf16.msra.mxu1 %v3550_v20  ;;  %v4065_v45 = vld [vmem:[#allocation4] ss:$16 sps:$4 sm:$0xff]   ;;  %v4073_v47 = vld [vmem:[#allocation4 + $0x24] ss:$16 sps:$4 sm:$0xff]  }
  0x55   :  { %320 = vmatprep.subr.bf16.mxu0 %v3545_v21  ;;  %361 = vmatprep.subr.bf16.mxu1 %v3547_v22  ;;  %v692_v40 = vsel %vm690_vm1, %v3560_v37, 0  ;;  %v698_v41 = vsel %vm690_vm1, %v3562_v39, 0  ;;  %v4068_v46 = vld [vmem:[#allocation4 + $0x200] ss:$16 sps:$4 sm:$0xff]   ;;  %v4076_v48 = vld [vmem:[#allocation4 + $0x224] ss:$16 sps:$4 sm:$0xff]  }
  0x56   :  { %v4071_v49 = vld [vmem:[#allocation4 + $0x20] ss:$16 sps:$4 sm:$0xff]   ;;  %v4079_v51 = vld [vmem:[#allocation4 + $0x44] ss:$16 sps:$4 sm:$0xff]  }
  0x57   :  { %3556 = vmatmul.mubr.msk.bf16.vlgmr.msra.gmra.mrb[0].mxu0 %vm234_vm0, %v94_v27  ;;  %3557 = vmatmul.mubr.msk.bf16.vlgmr.msra.gmra.mrb[0].mxu1 %vm234_vm0, %v94_v27  ;;  %v4074_v50 = vld [vmem:[#allocation4 + $0x220] ss:$16 sps:$4 sm:$0xff]   ;;  %v4082_v52 = vld [vmem:[#allocation4 + $0x244] ss:$16 sps:$4 sm:$0xff]  }
  0x58   :  { %321 = vmatpush1.bf16.msra.mxu0 %v3544_v28  ;;  %362 = vmatpush1.bf16.msra.mxu1 %v3546_v29  ;;  %v4077_v53 = vld [vmem:[#allocation4 + $0x40] ss:$16 sps:$4 sm:$0xff]   ;;  %v4085_v55 = vld [vmem:[#allocation4 + $0x64] ss:$16 sps:$4 sm:$0xff]  }
  0x59   :  { %322 = vmatprep.subr.bf16.mxu0 %v3553_v30  ;;  %363 = vmatprep.subr.bf16.mxu1 %v3555_v31  ;;  %v4080_v54 = vld [vmem:[#allocation4 + $0x240] ss:$16 sps:$4 sm:$0xff]   ;;  %v4088_v56 = vld [vmem:[#allocation4 + $0x264] ss:$16 sps:$4 sm:$0xff]  }
  0x5a   :  { %352 = vmatprep.mubr.bf16.mxu0 %v4707_v0  ;;  %393 = vmatprep.mubr.bf16.mxu1 %v4707_v0  ;;  %v4083_v57 = vld [vmem:[#allocation4 + $0x60] ss:$16 sps:$4 sm:$0xff]   ;;  %v4091_v59 = vld [vmem:[#allocation4 + $0x84] ss:$16 sps:$4 sm:$0xff]  }
  0x5b   :  { %v4086_v58 = vld [vmem:[#allocation4 + $0x260] ss:$16 sps:$4 sm:$0xff]   ;;  %v4094_v60 = vld [vmem:[#allocation4 + $0x284] ss:$16 sps:$4 sm:$0xff]  }
  0x5c   :  { %323 = vmatpush1.bf16.msra.mxu0 %v3552_v34  ;;  %364 = vmatpush1.bf16.msra.mxu1 %v3554_v35  ;;  %v4089_v61 = vld [vmem:[#allocation4 + $0x80] ss:$16 sps:$4 sm:$0xff]   ;;  %v4097_v63 = vld [vmem:[#allocation4 + $0xa4] ss:$16 sps:$4 sm:$0xff]  }
  0x5d   :  { %3564 = vmatprep.subr.msk.bf16.mxu0 %vm690_vm1, %v3561_v36  ;;  %3566 = vmatprep.subr.msk.bf16.mxu1 %vm690_vm1, %v3563_v38  ;;  %v4092_v62 = vld [vmem:[#allocation4 + $0x280] ss:$16 sps:$4 sm:$0xff]   ;;  %v4100_v1 = vld [vmem:[#allocation4 + $0x2a4] ss:$16 sps:$4 sm:$0xff]  }
  0x5e   :  { %v4098_v2 = vld [vmem:[#allocation4 + $0x2a0] ss:$16 sps:$4 sm:$0xff]   ;;  %v4103_v3 = vld [vmem:[#allocation4 + $0xc4] ss:$16 sps:$4 sm:$0xff]  }
  0x5f   :  { %3558 = vmatmul.mubr.msk.bf16.vlgmr.msra.gmra.mrb[4].mxu0 %vm234_vm0, %v94_v27  ;;  %3559 = vmatmul.mubr.msk.bf16.vlgmr.msra.gmra.mrb[4].mxu1 %vm234_vm0, %v94_v27  ;;  %v4106_v4 = vld [vmem:[#allocation4 + $0x2c4] ss:$16 sps:$4 sm:$0xff]   ;;  %v4101_v5 = vld [vmem:[#allocation4 + $0xc0] ss:$16 sps:$4 sm:$0xff]  }
  0x60   :  { %704 = vmatpush1.bf16.msra.mxu0 %v692_v40  ;;  %745 = vmatpush1.bf16.msra.mxu1 %v698_v41  ;;  %v4104_v6 = vld [vmem:[#allocation4 + $0x2c0] ss:$16 sps:$4 sm:$0xff]   ;;  %v4109_v7 = vld [vmem:[#allocation4 + $0xe4] ss:$16 sps:$4 sm:$0xff]  }
  0x61   :  { %735 = vmatprep.mubr.bf16.mxu0 %v4707_v0  ;;  %776 = vmatprep.mubr.bf16.mxu1 %v4707_v0  ;;  %v4095_v0 = vld [vmem:[#allocation4 + $0xa0] ss:$16 sps:$4 sm:$0xff]   ;;  %v4112_v8 = vld [vmem:[#allocation4 + $0x2e4] ss:$16 sps:$4 sm:$0xff]  }
  0x62   :  { %2065 = vmatprep.subr.bf16.mxu0 %v4067_v42  ;;  %2106 = vmatprep.subr.bf16.mxu1 %v4070_v43  ;;  %v4107_v9 = vld [vmem:[#allocation4 + $0xe0] ss:$16 sps:$4 sm:$0xff]   ;;  %v4115_v11 = vld [vmem:[#allocation4 + $0x104] ss:$16 sps:$4 sm:$0xff]  }
  0x63   :  { %v4110_v10 = vld [vmem:[#allocation4 + $0x2e0] ss:$16 sps:$4 sm:$0xff]   ;;  %v4118_v12 = vld [vmem:[#allocation4 + $0x304] ss:$16 sps:$4 sm:$0xff]  }
  0x64   :  { %v4113_v13 = vld [vmem:[#allocation4 + $0x100] ss:$16 sps:$4 sm:$0xff]   ;;  %v4121_v15 = vld [vmem:[#allocation4 + $0x124] ss:$16 sps:$4 sm:$0xff]  }
  0x65   :  { %v4116_v14 = vld [vmem:[#allocation4 + $0x300] ss:$16 sps:$4 sm:$0xff]   ;;  %v4124_v16 = vld [vmem:[#allocation4 + $0x324] ss:$16 sps:$4 sm:$0xff]  }
  0x66   :  { %v4119_v17 = vld [vmem:[#allocation4 + $0x120] ss:$16 sps:$4 sm:$0xff]   ;;  %v4127_v19 = vld [vmem:[#allocation4 + $0x144] ss:$16 sps:$4 sm:$0xff]  }
  0x67   :  { %3565 = vmatmul.mubr.msk.bf16.vlgmr.msra.gmra.mrb[8].mxu0 %vm686_vm2, %v95_v44  ;;  %3567 = vmatmul.mubr.msk.bf16.vlgmr.msra.gmra.mrb[8].mxu1 %vm686_vm2, %v95_v44  ;;  %v4122_v18 = vld [vmem:[#allocation4 + $0x320] ss:$16 sps:$4 sm:$0xff]   ;;  %v4130_v20 = vld [vmem:[#allocation4 + $0x344] ss:$16 sps:$4 sm:$0xff]  }
  0x68   :  { %2066 = vmatpush1.bf16.msra.mxu0 %v4065_v45  ;;  %2107 = vmatpush1.bf16.msra.mxu1 %v4068_v46  ;;  %v4125_v21 = vld [vmem:[#allocation4 + $0x140] ss:$16 sps:$4 sm:$0xff]   ;;  %v4133_v23 = vld [vmem:[#allocation4 + $0x164] ss:$16 sps:$4 sm:$0xff]   ;;  %v114_v45 = vlaneseq }
  0x69   :  { %2067 = vmatprep.subr.bf16.mxu0 %v4073_v47  ;;  %2108 = vmatprep.subr.bf16.mxu1 %v4076_v48  ;;  %v4128_v22 = vld [vmem:[#allocation4 + $0x340] ss:$16 sps:$4 sm:$0xff]   ;;  %v4136_v24 = vld [vmem:[#allocation4 + $0x364] ss:$16 sps:$4 sm:$0xff]  }
  0x6a   :  { %v4131_v25 = vld [vmem:[#allocation4 + $0x160] ss:$16 sps:$4 sm:$0xff]   ;;  %v4139_v27 = vld [vmem:[#allocation4 + $0x184] ss:$16 sps:$4 sm:$0xff]   ;;  %v4840_v46 = vshrl.u32 %v114_v45, 7 }
  0x6b   :  { %v4134_v26 = vld [vmem:[#allocation4 + $0x360] ss:$16 sps:$4 sm:$0xff]   ;;  %v4142_v28 = vld [vmem:[#allocation4 + $0x384] ss:$16 sps:$4 sm:$0xff]  }
  0x6c   :  { %2068 = vmatpush1.bf16.msra.mxu0 %v4071_v49  ;;  %2109 = vmatpush1.bf16.msra.mxu1 %v4074_v50  ;;  %v4137_v29 = vld [vmem:[#allocation4 + $0x180] ss:$16 sps:$4 sm:$0xff]   ;;  %v4145_v31 = vld [vmem:[#allocation4 + $0x1a4] ss:$16 sps:$4 sm:$0xff]   ;;  %v4843_v47 = vsub.s32 0, %v4840_v46  ;;  %v4851_v49 = vsub.s32 2, %v4840_v46 }
  0x6d   :  { %2069 = vmatprep.subr.bf16.mxu0 %v4079_v51  ;;  %2110 = vmatprep.subr.bf16.mxu1 %v4082_v52  ;;  %v4140_v30 = vld [vmem:[#allocation4 + $0x380] ss:$16 sps:$4 sm:$0xff]   ;;  %v4148_v32 = vld [vmem:[#allocation4 + $0x3a4] ss:$16 sps:$4 sm:$0xff]   ;;  %v4854_v50 = vsub.s32 1, %v4840_v46  ;;  %v128_v51 = vsub.s32 3, %v4840_v46 }
  0x6e   :  { %v4143_v33 = vld [vmem:[#allocation4 + $0x1a0] ss:$16 sps:$4 sm:$0xff]   ;;  %v4151_v35 = vld [vmem:[#allocation4 + $0x1c4] ss:$16 sps:$4 sm:$0xff]  }
  0x6f   :  { %v4146_v34 = vld [vmem:[#allocation4 + $0x3a0] ss:$16 sps:$4 sm:$0xff]   ;;  %v4154_v36 = vld [vmem:[#allocation4 + $0x3c4] ss:$16 sps:$4 sm:$0xff]  }
  0x70   :  { %2070 = vmatpush1.bf16.msra.mxu0 %v4077_v53  ;;  %2111 = vmatpush1.bf16.msra.mxu1 %v4080_v54  ;;  %v4149_v37 = vld [vmem:[#allocation4 + $0x1c0] ss:$16 sps:$4 sm:$0xff]   ;;  %v4157_v39 = vld [vmem:[#allocation4 + $0x1e4] ss:$16 sps:$4 sm:$0xff]  }
  0x71   :  { %2071 = vmatprep.subr.bf16.mxu0 %v4085_v55  ;;  %2112 = vmatprep.subr.bf16.mxu1 %v4088_v56  ;;  %v4152_v38 = vld [vmem:[#allocation4 + $0x3c0] ss:$16 sps:$4 sm:$0xff]   ;;  %v4160_v40 = vld [vmem:[#allocation4 + $0x3e4] ss:$16 sps:$4 sm:$0xff]  }
  0x72   :  { %v4155_v41 = vld [vmem:[#allocation4 + $0x1e0] ss:$16 sps:$4 sm:$0xff]   ;;  %v4163_v43 = vld [vmem:[#allocation4 + $0x404] ss:$16 sps:$4 sm:$0xff]  }
  0x73   :  { %v4158_v42 = vld [vmem:[#allocation4 + $0x3e0] ss:$16 sps:$4 sm:$0xff]   ;;  %v4166_v44 = vld [vmem:[#allocation4 + $0x604] ss:$16 sps:$4 sm:$0xff]  }
  0x74   :  { %2072 = vmatpush1.bf16.msra.mxu0 %v4083_v57  ;;  %2113 = vmatpush1.bf16.msra.mxu1 %v4086_v58  ;;  %v4848_v48 = vld [vmem:[%s4953_s3] sm:$0xff] }
  0x75   :  { %2073 = vmatprep.subr.bf16.mxu0 %v4091_v59  ;;  %2114 = vmatprep.subr.bf16.mxu1 %v4094_v60  ;;  %v117_v52 = vrot.slane %v4848_v48, %v4843_v47  ;;  %v125_v53 = vrot.slane %v4848_v48, %v4851_v49  ;;  %v121_v54 = vrot.slane %v4848_v48, %v4854_v50  ;;  %v4190_v45 = vld [vmem:[#allocation4 + $0x684] ss:$16 sps:$4 sm:$0xff]  }
  0x76   :  { %v129_v55 = vrot.slane %v4848_v48, %v128_v51 }
  0x78   :  { %2074 = vmatpush1.bf16.msra.mxu0 %v4089_v61  ;;  %2115 = vmatpush1.bf16.msra.mxu1 %v4092_v62 }
  0x79   :  { %2075 = vmatprep.subr.bf16.mxu0 %v4097_v63  ;;  %2116 = vmatprep.subr.bf16.mxu1 %v4100_v1 }
  0x7c   :  { %2076 = vmatpush1.bf16.msra.mxu0 %v4095_v0  ;;  %2117 = vmatpush1.bf16.msra.mxu1 %v4098_v2  ;;  %v136_v0 = vsub.s32 5, %v4840_v46 }
  0x7d   :  { %2077 = vmatprep.subr.bf16.mxu0 %v4103_v3  ;;  %2118 = vmatprep.subr.bf16.mxu1 %v4106_v4 }
  0x80   :  { %2078 = vmatpush1.bf16.msra.mxu0 %v4101_v5  ;;  %2119 = vmatpush1.bf16.msra.mxu1 %v4104_v6  ;;  %v144_v5 = vsub.s32 7, %v4840_v46 }
  0x81   :  { %2079 = vmatprep.subr.bf16.mxu0 %v4109_v7  ;;  %2120 = vmatprep.subr.bf16.mxu1 %v4112_v8 }
  0x84   :  { %2080 = vmatpush1.bf16.msra.mxu0 %v4107_v9  ;;  %2121 = vmatpush1.bf16.msra.mxu1 %v4110_v10 }
  0x85   :  { %2081 = vmatprep.subr.bf16.mxu0 %v4115_v11  ;;  %2122 = vmatprep.subr.bf16.mxu1 %v4118_v12  ;;  %v4161_v12 = vld [vmem:[#allocation4 + $0x400] ss:$16 sps:$4 sm:$0xff]  }
  0x88   :  { %2082 = vmatpush1.bf16.msra.mxu0 %v4113_v13  ;;  %2123 = vmatpush1.bf16.msra.mxu1 %v4116_v14  ;;  %v137_v13 = vrot.slane %v4848_v48, %v136_v0 }
  0x89   :  { %2083 = vmatprep.subr.bf16.mxu0 %v4121_v15  ;;  %2124 = vmatprep.subr.bf16.mxu1 %v4124_v16  ;;  %v4164_v16 = vld [vmem:[#allocation4 + $0x600] ss:$16 sps:$4 sm:$0xff]  }
  0x8c   :  { %2084 = vmatpush1.bf16.msra.mxu0 %v4119_v17  ;;  %2125 = vmatpush1.bf16.msra.mxu1 %v4122_v18  ;;  %v4169_v17 = vld [vmem:[#allocation4 + $0x424] ss:$16 sps:$4 sm:$0xff]   ;;  %v145_v18 = vrot.slane %v4848_v48, %v144_v5  ;;  %v4200_v5 = vld [vmem:[#allocation4 + $0x6c0] ss:$16 sps:$4 sm:$0xff]  }
  0x8d   :  { %2085 = vmatprep.subr.bf16.mxu0 %v4127_v19  ;;  %2126 = vmatprep.subr.bf16.mxu1 %v4130_v20  ;;  %v4172_v19 = vld [vmem:[#allocation4 + $0x624] ss:$16 sps:$4 sm:$0xff]  }
  0x90   :  { %2086 = vmatpush1.bf16.msra.mxu0 %v4125_v21  ;;  %2127 = vmatpush1.bf16.msra.mxu1 %v4128_v22 }
  0x91   :  { %2087 = vmatprep.subr.bf16.mxu0 %v4133_v23  ;;  %2128 = vmatprep.subr.bf16.mxu1 %v4136_v24  ;;  %v4167_v23 = vld [vmem:[#allocation4 + $0x420] ss:$16 sps:$4 sm:$0xff]  }
  0x94   :  { %2088 = vmatpush1.bf16.msra.mxu0 %v4131_v25  ;;  %2129 = vmatpush1.bf16.msra.mxu1 %v4134_v26 }
  0x95   :  { %2089 = vmatprep.subr.bf16.mxu0 %v4139_v27  ;;  %2130 = vmatprep.subr.bf16.mxu1 %v4142_v28  ;;  %v4170_v27 = vld [vmem:[#allocation4 + $0x620] ss:$16 sps:$4 sm:$0xff]   ;;  %v4175_v28 = vld [vmem:[#allocation4 + $0x444] ss:$16 sps:$4 sm:$0xff]  }
  0x98   :  { %2090 = vmatpush1.bf16.msra.mxu0 %v4137_v29  ;;  %2131 = vmatpush1.bf16.msra.mxu1 %v4140_v30 }
  0x99   :  { %2091 = vmatprep.subr.bf16.mxu0 %v4145_v31  ;;  %2132 = vmatprep.subr.bf16.mxu1 %v4148_v32  ;;  %v4178_v32 = vld [vmem:[#allocation4 + $0x644] ss:$16 sps:$4 sm:$0xff]  }
  0x9c   :  { %2092 = vmatpush1.bf16.msra.mxu0 %v4143_v33  ;;  %2133 = vmatpush1.bf16.msra.mxu1 %v4146_v34 }
  0x9d   :  { %2093 = vmatprep.subr.bf16.mxu0 %v4151_v35  ;;  %2134 = vmatprep.subr.bf16.mxu1 %v4154_v36  ;;  %v4173_v36 = vld [vmem:[#allocation4 + $0x440] ss:$16 sps:$4 sm:$0xff]  }
  0xa0   :  { %2094 = vmatpush1.bf16.msra.mxu0 %v4149_v37  ;;  %2135 = vmatpush1.bf16.msra.mxu1 %v4152_v38  ;;  %v4176_v38 = vld [vmem:[#allocation4 + $0x640] ss:$16 sps:$4 sm:$0xff]  }
  0xa1   :  { %2095 = vmatprep.subr.bf16.mxu0 %v4157_v39  ;;  %2136 = vmatprep.subr.bf16.mxu1 %v4160_v40  ;;  %v4181_v39 = vld [vmem:[#allocation4 + $0x464] ss:$16 sps:$4 sm:$0xff]  }
  0xa4   :  { %2096 = vmatpush1.bf16.msra.mxu0 %v4155_v41  ;;  %2137 = vmatpush1.bf16.msra.mxu1 %v4158_v42  ;;  %v4184_v41 = vld [vmem:[#allocation4 + $0x664] ss:$16 sps:$4 sm:$0xff]   ;;  %v4179_v42 = vld [vmem:[#allocation4 + $0x460] ss:$16 sps:$4 sm:$0xff]  }
  0xa5   :  { %2147 = vmatprep.subr.bf16.mxu0 %v4163_v43  ;;  %2188 = vmatprep.subr.bf16.mxu1 %v4166_v44  ;;  %v4182_v43 = vld [vmem:[#allocation4 + $0x660] ss:$16 sps:$4 sm:$0xff]   ;;  %v4187_v44 = vld [vmem:[#allocation4 + $0x484] ss:$16 sps:$4 sm:$0xff]  }
 0x12a   :  { %v272_v56 = vpop.f32.mrb[0].mxu0  ;;  %v313_v58 = vpop.f32.mrb[0].mxu1 }
 0x12b   :  { %v273_v57 = vadd.f32 %v272_v56, %v117_v52  ;;  %v274_v59 = vpop.f32.mrb[1].mxu0  ;;  %v314_v60 = vadd.f32 %v313_v58, %v125_v53  ;;  %v315_v62 = vpop.f32.mrb[1].mxu1  ;;  %v4185_v52 = vld [vmem:[#allocation4 + $0x480] ss:$16 sps:$4 sm:$0xff]  }
 0x12c   :  { %v275_v61 = vadd.f32 %v274_v59, %v121_v54  ;;  %v276_v63 = vpop.f32.mrb[2].mxu0  ;;  %v316_v2 = vadd.f32 %v315_v62, %v129_v55  ;;  %v317_v3 = vpop.f32.mrb[2].mxu1  ;;  %v4188_v53 = vld [vmem:[#allocation4 + $0x680] ss:$16 sps:$4 sm:$0xff]   ;;  %v4193_v54 = vld [vmem:[#allocation4 + $0x4a4] ss:$16 sps:$4 sm:$0xff]  }
 0x12d   :  { %v402_v1 = vmax.f32 %v273_v57, 0.0  ;;  %v277_v4 = vpop.f32.mrb[3].mxu0  ;;  %v404_v6 = vmax.f32 %v314_v60, 0.0  ;;  %v318_v8 = vpop.f32.mrb[3].mxu1  ;;  %v4196_v55 = vld [vmem:[#allocation4 + $0x6a4] ss:$16 sps:$4 sm:$0xff]  }
 0x12e   :  { %v403_v7 = vmax.f32 %v275_v61, 0.0  ;;  %v405_v9 = vmax.f32 %v316_v2, 0.0  ;;  %v4191_v57 = vld [vmem:[#allocation4 + $0x4a0] ss:$16 sps:$4 sm:$0xff]   ;;  %v4199_v59 = vld [vmem:[#allocation4 + $0x4c4] ss:$16 sps:$4 sm:$0xff]  }
 0x12f   :  { %v4868_v10 = vpack.c.bf16 %v404_v6, %v404_v6  ;;  %v4873_v14 = vpack.c.bf16 %v402_v1, %v402_v1  ;;  %v4194_v58 = vld [vmem:[#allocation4 + $0x6a0] ss:$16 sps:$4 sm:$0xff]   ;;  %v4202_v62 = vld [vmem:[#allocation4 + $0x6c4] ss:$16 sps:$4 sm:$0xff]  }
 0x130   :  { %v4870_v11 = vpack.c.bf16 %v403_v7, %v403_v7  ;;  %v4875_v15 = vpack.c.bf16 %v405_v9, %v405_v9  ;;  %v4197_v3 = vld [vmem:[#allocation4 + $0x4c0] ss:$16 sps:$4 sm:$0xff]   ;;  %v4205_v6 = vld [vmem:[#allocation4 + $0x4e4] ss:$16 sps:$4 sm:$0xff]  }
 0x131   :  { %v4208_v7 = vld [vmem:[#allocation4 + $0x6e4] ss:$16 sps:$4 sm:$0xff]   ;;  %v4203_v8 = vld [vmem:[#allocation4 + $0x4e0] ss:$16 sps:$4 sm:$0xff]  }
 0x132   :  { %2097 = vmatprep.mubr.bf16.mxu0 %v4870_v11  ;;  %v4879_v20 = vpop.f32.mrb[4].mxu0  ;;  %2138 = vmatprep.mubr.bf16.mxu1 %v4875_v15  ;;  %v4883_v22 = vpop.f32.mrb[4].mxu1  ;;  %v4206_v9 = vld [vmem:[#allocation4 + $0x6e0] ss:$16 sps:$4 sm:$0xff]  }
 0x133   :  { %2098 = vmatmul.mubr.bf16.vlgmr.msra.gmra.mrb[12].mxu0 %v4873_v14  ;;  %v356_v21 = vpop.f32.mrb[5].mxu0  ;;  %2139 = vmatmul.mubr.bf16.vlgmr.msra.gmra.mrb[12].mxu1 %v4868_v10  ;;  %v397_v26 = vpop.f32.mrb[5].mxu1 }
 0x134   :  { %2148 = vmatpush1.bf16.msra.mxu0 %v4161_v12  ;;  %v357_v24 = vadd.f32 %v356_v21, %v137_v13  ;;  %v358_v25 = vpop.f32.mrb[6].mxu0  ;;  %2189 = vmatpush1.bf16.msra.mxu1 %v4164_v16  ;;  %v398_v30 = vadd.f32 %v397_v26, %v145_v18  ;;  %v399_v31 = vpop.f32.mrb[6].mxu1  ;;  %v4211_v12 = vld [vmem:[#allocation4 + $0x504] ss:$16 sps:$4 sm:$0xff]   ;;  %v4209_v16 = vld [vmem:[#allocation4 + $0x500] ss:$16 sps:$4 sm:$0xff]  }
 0x135   :  { %2149 = vmatprep.subr.bf16.mxu0 %v4169_v17  ;;  %v359_v29 = vpop.f32.mrb[7].mxu0  ;;  %2190 = vmatprep.subr.bf16.mxu1 %v4172_v19  ;;  %v400_v34 = vpop.f32.mrb[7].mxu1  ;;  %v4214_v13 = vld [vmem:[#allocation4 + $0x704] ss:$16 sps:$4 sm:$0xff]   ;;  %v4212_v17 = vld [vmem:[#allocation4 + $0x700] ss:$16 sps:$4 sm:$0xff]  }
 0x136   :  { %v407_v33 = vmax.f32 %v357_v24, 0.0  ;;  %v409_v35 = vmax.f32 %v398_v30, 0.0  ;;  %v4217_v18 = vld [vmem:[#allocation4 + $0x524] ss:$16 sps:$4 sm:$0xff]   ;;  %v4215_v21 = vld [vmem:[#allocation4 + $0x520] ss:$16 sps:$4 sm:$0xff]  }
 0x137   :  { %v4220_v19 = vld [vmem:[#allocation4 + $0x724] ss:$16 sps:$4 sm:$0xff]   ;;  %v4221_v26 = vld [vmem:[#allocation4 + $0x540] ss:$16 sps:$4 sm:$0xff]   ;;  %v132_v34 = vsub.s32 4, %v4840_v46 }
 0x138   :  { %2150 = vmatpush1.bf16.msra.mxu0 %v4167_v23  ;;  %v4886_v37 = vpack.c.bf16 %v407_v33, %v407_v33  ;;  %2191 = vmatpush1.bf16.msra.mxu1 %v4170_v27  ;;  %v4888_v40 = vpack.c.bf16 %v409_v35, %v409_v35  ;;  %v4218_v23 = vld [vmem:[#allocation4 + $0x720] ss:$16 sps:$4 sm:$0xff]   ;;  %v4223_v24 = vld [vmem:[#allocation4 + $0x544] ss:$16 sps:$4 sm:$0xff]  }
 0x139   :  { %2151 = vmatprep.subr.bf16.mxu0 %v4175_v28  ;;  %2192 = vmatprep.subr.bf16.mxu1 %v4178_v32  ;;  %v4226_v25 = vld [vmem:[#allocation4 + $0x744] ss:$16 sps:$4 sm:$0xff]   ;;  %v4224_v27 = vld [vmem:[#allocation4 + $0x740] ss:$16 sps:$4 sm:$0xff]  }
 0x13a   :  { %2179 = vmatprep.mubr.bf16.mxu0 %v4886_v37  ;;  %2220 = vmatprep.mubr.bf16.mxu1 %v4888_v40  ;;  %v4892_v56 = vpop.f32.mrb[8].mxu0  ;;  %v4896_v61 = vpop.f32.mrb[8].mxu1  ;;  %v4229_v28 = vld [vmem:[#allocation4 + $0x564] ss:$16 sps:$4 sm:$0xff]   ;;  %v4227_v30 = vld [vmem:[#allocation4 + $0x560] ss:$16 sps:$4 sm:$0xff]  }
 0x13b   :  { %v4894_v60 = vpop.f32.mrb[9].mxu0  ;;  %v4898_v0 = vpop.f32.mrb[9].mxu1  ;;  %v4232_v29 = vld [vmem:[#allocation4 + $0x764] ss:$16 sps:$4 sm:$0xff]   ;;  %v4230_v31 = vld [vmem:[#allocation4 + $0x760] ss:$16 sps:$4 sm:$0xff]  }
 0x13c   :  { %2152 = vmatpush1.bf16.msra.mxu0 %v4173_v36  ;;  %2193 = vmatpush1.bf16.msra.mxu1 %v4176_v38  ;;  %v741_v63 = vpop.f32.mrb[10].mxu0  ;;  %v782_v2 = vpop.f32.mrb[10].mxu1  ;;  %v4235_v32 = vld [vmem:[#allocation4 + $0x584] ss:$16 sps:$4 sm:$0xff]   ;;  %v4233_v35 = vld [vmem:[#allocation4 + $0x580] ss:$16 sps:$4 sm:$0xff]  }
 0x13d   :  { %2153 = vmatprep.subr.bf16.mxu0 %v4181_v39  ;;  %2194 = vmatprep.subr.bf16.mxu1 %v4184_v41  ;;  %v742_v1 = vpop.f32.mrb[11].mxu0  ;;  %v783_v4 = vpop.f32.mrb[11].mxu1  ;;  %v4238_v33 = vld [vmem:[#allocation4 + $0x784] ss:$16 sps:$4 sm:$0xff]   ;;  %v140_v36 = vsub.s32 6, %v4840_v46  ;;  %v4580_v46 = vld [vmem:[#allocation7 + $0x8] sm:$0xff]  }
 0x13e   :  { %v4236_v38 = vld [vmem:[#allocation4 + $0x780] ss:$16 sps:$4 sm:$0xff]   ;;  %v4241_v39 = vld [vmem:[#allocation4 + $0x5a4] ss:$16 sps:$4 sm:$0xff]  }
 0x13f   :  { %v4244_v41 = vld [vmem:[#allocation4 + $0x7a4] ss:$16 sps:$4 sm:$0xff]   ;;  %v4251_v1 = vld [vmem:[#allocation4 + $0x5e0] ss:$16 sps:$4 sm:$0xff]  }
 0x140   :  { %2154 = vmatpush1.bf16.msra.mxu0 %v4179_v42  ;;  %2195 = vmatpush1.bf16.msra.mxu1 %v4182_v43  ;;  %v133_v42 = vrot.slane %v4848_v48, %v132_v34  ;;  %v4239_v43 = vld [vmem:[#allocation4 + $0x5a0] ss:$16 sps:$4 sm:$0xff]   ;;  %v4296_v34 = vld [vmem:[#allocation4 + $0x2c8] ss:$16 sps:$4 sm:$0xff]  }
 0x141   :  { %2155 = vmatprep.subr.bf16.mxu0 %v4187_v44  ;;  %2196 = vmatprep.subr.bf16.mxu1 %v4190_v45  ;;  %v141_v44 = vrot.slane %v4848_v48, %v140_v36  ;;  %v4242_v45 = vld [vmem:[#allocation4 + $0x7a0] ss:$16 sps:$4 sm:$0xff]   ;;  %v4304_v36 = vld [vmem:[#allocation4 + $0x2ec] ss:$16 sps:$4 sm:$0xff]  }
 0x142   :  { %v4254_v2 = vld [vmem:[#allocation4 + $0x7e0] ss:$16 sps:$4 sm:$0xff]  }
 0x144   :  { %2156 = vmatpush1.bf16.msra.mxu0 %v4185_v52  ;;  %2197 = vmatpush1.bf16.msra.mxu1 %v4188_v53  ;;  %v4247_v52 = vld [vmem:[#allocation4 + $0x5c4] ss:$16 sps:$4 sm:$0xff]  }
 0x145   :  { %2157 = vmatprep.subr.bf16.mxu0 %v4193_v54  ;;  %2198 = vmatprep.subr.bf16.mxu1 %v4196_v55  ;;  %v4250_v53 = vld [vmem:[#allocation4 + $0x7c4] ss:$16 sps:$4 sm:$0xff]   ;;  %v355_v54 = vadd.f32 %v4879_v20, %v133_v42  ;;  %v396_v55 = vadd.f32 %v4883_v22, %v141_v44  ;;  %v4262_v20 = vld [vmem:[#allocation4 + $0x20c] ss:$16 sps:$4 sm:$0xff]   ;;  %v4308_v44 = vld [vmem:[#allocation4 + $0x308] ss:$16 sps:$4 sm:$0xff]  }
 0x146   :  { %v4310_v42 = vld [vmem:[#allocation4 + $0x30c] ss:$16 sps:$4 sm:$0xff]  }
 0x147   :  { %v406_v63 = vmax.f32 %v355_v54, 0.0  ;;  %v408_v48 = vmax.f32 %v396_v55, 0.0  ;;  %v4314_v54 = vld [vmem:[#allocation4 + $0x328] ss:$16 sps:$4 sm:$0xff]   ;;  %v4319_v55 = vld [vmem:[#allocation4 + $0x14c] ss:$16 sps:$4 sm:$0xff]  }
 0x148   :  { %2158 = vmatpush1.bf16.msra.mxu0 %v4191_v57  ;;  %2199 = vmatpush1.bf16.msra.mxu1 %v4194_v58  ;;  %v4245_v57 = vld [vmem:[#allocation4 + $0x5c0] ss:$16 sps:$4 sm:$0xff]  }
 0x149   :  { %2159 = vmatprep.subr.bf16.mxu0 %v4199_v59  ;;  %2200 = vmatprep.subr.bf16.mxu1 %v4202_v62  ;;  %v4248_v58 = vld [vmem:[#allocation4 + $0x7c0] ss:$16 sps:$4 sm:$0xff]   ;;  %v4253_v59 = vld [vmem:[#allocation4 + $0x5e4] ss:$16 sps:$4 sm:$0xff]   ;;  %v4906_v4 = vpack.c.bf16 %v406_v63, %v406_v63  ;;  %v4908_v22 = vpack.c.bf16 %v408_v48, %v408_v48  ;;  %v4328_v63 = vld [vmem:[#allocation4 + $0x36c] ss:$16 sps:$4 sm:$0xff]  }
 0x14a   :  { %v4256_v62 = vld [vmem:[#allocation4 + $0x7e4] ss:$16 sps:$4 sm:$0xff]   ;;  %v4323_v48 = vld [vmem:[#allocation4 + $0x168] ss:$16 sps:$4 sm:$0xff]  }
 0x14c   :  { %2160 = vmatpush1.bf16.msra.mxu0 %v4197_v3  ;;  %2201 = vmatpush1.bf16.msra.mxu1 %v4200_v5  ;;  %v4259_v3 = vld [vmem:[#allocation4 + $0xc] ss:$16 sps:$4 sm:$0xff]   ;;  %v4257_v5 = vld [vmem:[#allocation4 + $0x8] ss:$16 sps:$4 sm:$0xff]  }
 0x14d   :  { %2161 = vmatprep.subr.bf16.mxu0 %v4205_v6  ;;  %2202 = vmatprep.subr.bf16.mxu1 %v4208_v7  ;;  %v4260_v6 = vld [vmem:[#allocation4 + $0x208] ss:$16 sps:$4 sm:$0xff]   ;;  %v4265_v7 = vld [vmem:[#allocation4 + $0x2c] ss:$16 sps:$4 sm:$0xff]  }
 0x150   :  { %2162 = vmatpush1.bf16.msra.mxu0 %v4203_v8  ;;  %2203 = vmatpush1.bf16.msra.mxu1 %v4206_v9  ;;  %v4268_v8 = vld [vmem:[#allocation4 + $0x22c] ss:$16 sps:$4 sm:$0xff]   ;;  %v4263_v9 = vld [vmem:[#allocation4 + $0x28] ss:$16 sps:$4 sm:$0xff]  }
 0x151   :  { %2163 = vmatprep.subr.bf16.mxu0 %v4211_v12  ;;  %2204 = vmatprep.subr.bf16.mxu1 %v4214_v13  ;;  %v4266_v12 = vld [vmem:[#allocation4 + $0x228] ss:$16 sps:$4 sm:$0xff]   ;;  %v4271_v13 = vld [vmem:[#allocation4 + $0x4c] ss:$16 sps:$4 sm:$0xff]  }
 0x154   :  { %2164 = vmatpush1.bf16.msra.mxu0 %v4209_v16  ;;  %2205 = vmatpush1.bf16.msra.mxu1 %v4212_v17  ;;  %v4274_v16 = vld [vmem:[#allocation4 + $0x24c] ss:$16 sps:$4 sm:$0xff]   ;;  %v4269_v17 = vld [vmem:[#allocation4 + $0x48] ss:$16 sps:$4 sm:$0xff]  }
 0x155   :  { %2165 = vmatprep.subr.bf16.mxu0 %v4217_v18  ;;  %2206 = vmatprep.subr.bf16.mxu1 %v4220_v19  ;;  %v4272_v18 = vld [vmem:[#allocation4 + $0x248] ss:$16 sps:$4 sm:$0xff]   ;;  %v4277_v19 = vld [vmem:[#allocation4 + $0x6c] ss:$16 sps:$4 sm:$0xff]  }
 0x158   :  { %2166 = vmatpush1.bf16.msra.mxu0 %v4215_v21  ;;  %2207 = vmatpush1.bf16.msra.mxu1 %v4218_v23  ;;  %v4280_v21 = vld [vmem:[#allocation4 + $0x26c] ss:$16 sps:$4 sm:$0xff]   ;;  %v4275_v23 = vld [vmem:[#allocation4 + $0x68] ss:$16 sps:$4 sm:$0xff]  }
 0x159   :  { %2167 = vmatprep.subr.bf16.mxu0 %v4223_v24  ;;  %2208 = vmatprep.subr.bf16.mxu1 %v4226_v25  ;;  %v4283_v24 = vld [vmem:[#allocation4 + $0x8c] ss:$16 sps:$4 sm:$0xff]  }
 0x15a   :  { %v4286_v25 = vld [vmem:[#allocation4 + $0x28c] ss:$16 sps:$4 sm:$0xff]  }
 0x15c   :  { %2168 = vmatpush1.bf16.msra.mxu0 %v4221_v26  ;;  %2209 = vmatpush1.bf16.msra.mxu1 %v4224_v27  ;;  %v4284_v26 = vld [vmem:[#allocation4 + $0x288] ss:$16 sps:$4 sm:$0xff]   ;;  %v4289_v27 = vld [vmem:[#allocation4 + $0xac] ss:$16 sps:$4 sm:$0xff]  }
 0x15d   :  { %2169 = vmatprep.subr.bf16.mxu0 %v4229_v28  ;;  %2210 = vmatprep.subr.bf16.mxu1 %v4232_v29  ;;  %v4292_v28 = vld [vmem:[#allocation4 + $0x2ac] ss:$16 sps:$4 sm:$0xff]   ;;  %v4287_v29 = vld [vmem:[#allocation4 + $0xa8] ss:$16 sps:$4 sm:$0xff]  }
 0x160   :  { %2170 = vmatpush1.bf16.msra.mxu0 %v4227_v30  ;;  %2211 = vmatpush1.bf16.msra.mxu1 %v4230_v31  ;;  %v4290_v30 = vld [vmem:[#allocation4 + $0x2a8] ss:$16 sps:$4 sm:$0xff]   ;;  %v4295_v31 = vld [vmem:[#allocation4 + $0xcc] ss:$16 sps:$4 sm:$0xff]  }
 0x161   :  { %2171 = vmatprep.subr.bf16.mxu0 %v4235_v32  ;;  %2212 = vmatprep.subr.bf16.mxu1 %v4238_v33  ;;  %v4298_v32 = vld [vmem:[#allocation4 + $0x2cc] ss:$16 sps:$4 sm:$0xff]   ;;  %v4293_v33 = vld [vmem:[#allocation4 + $0xc8] ss:$16 sps:$4 sm:$0xff]  }
 0x164   :  { %2172 = vmatpush1.bf16.msra.mxu0 %v4233_v35  ;;  %2213 = vmatpush1.bf16.msra.mxu1 %v4236_v38  ;;  %v4301_v35 = vld [vmem:[#allocation4 + $0xec] ss:$16 sps:$4 sm:$0xff]   ;;  %v4299_v38 = vld [vmem:[#allocation4 + $0xe8] ss:$16 sps:$4 sm:$0xff]  }
 0x165   :  { %2173 = vmatprep.subr.bf16.mxu0 %v4241_v39  ;;  %2214 = vmatprep.subr.bf16.mxu1 %v4244_v41  ;;  %v4302_v39 = vld [vmem:[#allocation4 + $0x2e8] ss:$16 sps:$4 sm:$0xff]   ;;  %v4307_v41 = vld [vmem:[#allocation4 + $0x10c] ss:$16 sps:$4 sm:$0xff]  }
 0x168   :  { %2174 = vmatpush1.bf16.msra.mxu0 %v4239_v43  ;;  %2215 = vmatpush1.bf16.msra.mxu1 %v4242_v45  ;;  %v4305_v43 = vld [vmem:[#allocation4 + $0x108] ss:$16 sps:$4 sm:$0xff]   ;;  %v4313_v45 = vld [vmem:[#allocation4 + $0x12c] ss:$16 sps:$4 sm:$0xff]  }
 0x169   :  { %2175 = vmatprep.subr.bf16.mxu0 %v4247_v52  ;;  %2216 = vmatprep.subr.bf16.mxu1 %v4250_v53  ;;  %v4316_v52 = vld [vmem:[#allocation4 + $0x32c] ss:$16 sps:$4 sm:$0xff]   ;;  %v4311_v53 = vld [vmem:[#allocation4 + $0x128] ss:$16 sps:$4 sm:$0xff]  }
 0x16c   :  { %2176 = vmatpush1.bf16.msra.mxu0 %v4245_v57  ;;  %2217 = vmatpush1.bf16.msra.mxu1 %v4248_v58  ;;  %v4322_v57 = vld [vmem:[#allocation4 + $0x34c] ss:$16 sps:$4 sm:$0xff]   ;;  %v4317_v58 = vld [vmem:[#allocation4 + $0x148] ss:$16 sps:$4 sm:$0xff]  }
 0x16d   :  { %2177 = vmatprep.subr.bf16.mxu0 %v4253_v59  ;;  %2218 = vmatprep.subr.bf16.mxu1 %v4256_v62  ;;  %v4320_v59 = vld [vmem:[#allocation4 + $0x348] ss:$16 sps:$4 sm:$0xff]   ;;  %v4325_v62 = vld [vmem:[#allocation4 + $0x16c] ss:$16 sps:$4 sm:$0xff]  }
 0x170   :  { %2178 = vmatpush1.bf16.msra.mxu0 %v4251_v1  ;;  %2219 = vmatpush1.bf16.msra.mxu1 %v4254_v2  ;;  %v4326_v1 = vld [vmem:[#allocation4 + $0x368] ss:$16 sps:$4 sm:$0xff]   ;;  %v4331_v2 = vld [vmem:[#allocation4 + $0x18c] ss:$16 sps:$4 sm:$0xff]  }
 0x171   :  { %2229 = vmatprep.subr.bf16.mxu0 %v4259_v3  ;;  %2270 = vmatprep.subr.bf16.mxu1 %v4262_v20  ;;  %v4334_v3 = vld [vmem:[#allocation4 + $0x38c] ss:$16 sps:$4 sm:$0xff]   ;;  %v4329_v20 = vld [vmem:[#allocation4 + $0x188] ss:$16 sps:$4 sm:$0xff]  }
 0x173   :  { %2180 = vmatmul.mubr.bf16.vlgmr.msra.gmra.mrb[16].mxu0 %v4906_v4  ;;  %2221 = vmatmul.mubr.bf16.vlgmr.msra.gmra.mrb[16].mxu1 %v4908_v22 }
 0x174   :  { %2230 = vmatpush1.bf16.msra.mxu0 %v4257_v5  ;;  %2261 = vmatprep.mubr.bf16.mxu0 %v4870_v11  ;;  %v4278_v11 = vld [vmem:[#allocation4 + $0x268] ss:$16 sps:$4 sm:$0xff]  }
 0x175   :  { %2271 = vmatpush1.bf16.msra.mxu1 %v4260_v6  ;;  %2302 = vmatprep.mubr.bf16.mxu1 %v4875_v15  ;;  %v4281_v15 = vld [vmem:[#allocation4 + $0x88] ss:$16 sps:$4 sm:$0xff]   ;;  %v4337_v6 = vld [vmem:[#allocation4 + $0x1ac] ss:$16 sps:$4 sm:$0xff]  }
 0x176   :  { %2231 = vmatprep.subr.bf16.mxu0 %v4265_v7  ;;  %2272 = vmatprep.subr.bf16.mxu1 %v4268_v8  ;;  %v4332_v5 = vld [vmem:[#allocation4 + $0x388] ss:$16 sps:$4 sm:$0xff]   ;;  %v4340_v7 = vld [vmem:[#allocation4 + $0x3ac] ss:$16 sps:$4 sm:$0xff]  }
 0x177   :  { %v4335_v8 = vld [vmem:[#allocation4 + $0x1a8] ss:$16 sps:$4 sm:$0xff]  }
 0x178   :  { %2232 = vmatpush1.bf16.msra.mxu0 %v4263_v9  ;;  %v4338_v9 = vld [vmem:[#allocation4 + $0x3a8] ss:$16 sps:$4 sm:$0xff]  }
 0x179   :  { %2273 = vmatpush1.bf16.msra.mxu1 %v4266_v12  ;;  %2233 = vmatprep.subr.bf16.mxu0 %v4271_v13  ;;  %v4343_v12 = vld [vmem:[#allocation4 + $0x1cc] ss:$16 sps:$4 sm:$0xff]  }
 0x17a   :  { %2274 = vmatprep.subr.bf16.mxu1 %v4274_v16  ;;  %v4346_v13 = vld [vmem:[#allocation4 + $0x3cc] ss:$16 sps:$4 sm:$0xff]   ;;  %v4341_v16 = vld [vmem:[#allocation4 + $0x1c8] ss:$16 sps:$4 sm:$0xff]  }
 0x17c   :  { %2234 = vmatpush1.bf16.msra.mxu0 %v4269_v17  ;;  %v4344_v17 = vld [vmem:[#allocation4 + $0x3c8] ss:$16 sps:$4 sm:$0xff]  }
 0x17d   :  { %2275 = vmatpush1.bf16.msra.mxu1 %v4272_v18  ;;  %2235 = vmatprep.subr.bf16.mxu0 %v4277_v19  ;;  %v4349_v18 = vld [vmem:[#allocation4 + $0x1ec] ss:$16 sps:$4 sm:$0xff]  }
 0x17e   :  { %2276 = vmatprep.subr.bf16.mxu1 %v4280_v21  ;;  %v4352_v19 = vld [vmem:[#allocation4 + $0x3ec] ss:$16 sps:$4 sm:$0xff]   ;;  %v4347_v21 = vld [vmem:[#allocation4 + $0x1e8] ss:$16 sps:$4 sm:$0xff]  }
 0x180   :  { %2236 = vmatpush1.bf16.msra.mxu0 %v4275_v23  ;;  %v4350_v23 = vld [vmem:[#allocation4 + $0x3e8] ss:$16 sps:$4 sm:$0xff]  }
 0x181   :  { %2277 = vmatpush1.bf16.msra.mxu1 %v4278_v11  ;;  %2237 = vmatprep.subr.bf16.mxu0 %v4283_v24  ;;  %v4355_v11 = vld [vmem:[#allocation4 + $0x40c] ss:$16 sps:$4 sm:$0xff]  }
 0x182   :  { %2278 = vmatprep.subr.bf16.mxu1 %v4286_v25  ;;  %v4358_v24 = vld [vmem:[#allocation4 + $0x60c] ss:$16 sps:$4 sm:$0xff]   ;;  %v4353_v25 = vld [vmem:[#allocation4 + $0x408] ss:$16 sps:$4 sm:$0xff]  }
 0x184   :  { %2238 = vmatpush1.bf16.msra.mxu0 %v4281_v15  ;;  %v4356_v15 = vld [vmem:[#allocation4 + $0x608] ss:$16 sps:$4 sm:$0xff]  }
 0x185   :  { %2279 = vmatpush1.bf16.msra.mxu1 %v4284_v26  ;;  %2239 = vmatprep.subr.bf16.mxu0 %v4289_v27  ;;  %v4361_v26 = vld [vmem:[#allocation4 + $0x42c] ss:$16 sps:$4 sm:$0xff]  }
 0x186   :  { %2280 = vmatprep.subr.bf16.mxu1 %v4292_v28  ;;  %v4364_v27 = vld [vmem:[#allocation4 + $0x62c] ss:$16 sps:$4 sm:$0xff]   ;;  %v4359_v28 = vld [vmem:[#allocation4 + $0x428] ss:$16 sps:$4 sm:$0xff]  }
 0x188   :  { %2240 = vmatpush1.bf16.msra.mxu0 %v4287_v29  ;;  %v4362_v29 = vld [vmem:[#allocation4 + $0x628] ss:$16 sps:$4 sm:$0xff]  }
 0x189   :  { %2281 = vmatpush1.bf16.msra.mxu1 %v4290_v30  ;;  %2241 = vmatprep.subr.bf16.mxu0 %v4295_v31  ;;  %v4367_v30 = vld [vmem:[#allocation4 + $0x44c] ss:$16 sps:$4 sm:$0xff]  }
 0x18a   :  { %2282 = vmatprep.subr.bf16.mxu1 %v4298_v32  ;;  %v4370_v31 = vld [vmem:[#allocation4 + $0x64c] ss:$16 sps:$4 sm:$0xff]   ;;  %v4365_v32 = vld [vmem:[#allocation4 + $0x448] ss:$16 sps:$4 sm:$0xff]  }
 0x18c   :  { %2242 = vmatpush1.bf16.msra.mxu0 %v4293_v33  ;;  %v4373_v33 = vld [vmem:[#allocation4 + $0x46c] ss:$16 sps:$4 sm:$0xff]  }
 0x18d   :  { %2283 = vmatpush1.bf16.msra.mxu1 %v4296_v34  ;;  %2243 = vmatprep.subr.bf16.mxu0 %v4301_v35  ;;  %v4371_v34 = vld [vmem:[#allocation4 + $0x468] ss:$16 sps:$4 sm:$0xff]   ;;  %v4379_v35 = vld [vmem:[#allocation4 + $0x48c] ss:$16 sps:$4 sm:$0xff]  }
 0x18e   :  { %2284 = vmatprep.subr.bf16.mxu1 %v4304_v36  ;;  %v4382_v36 = vld [vmem:[#allocation4 + $0x68c] ss:$16 sps:$4 sm:$0xff]  }
 0x190   :  { %2244 = vmatpush1.bf16.msra.mxu0 %v4299_v38  ;;  %v4380_v38 = vld [vmem:[#allocation4 + $0x688] ss:$16 sps:$4 sm:$0xff]  }
 0x191   :  { %2285 = vmatpush1.bf16.msra.mxu1 %v4302_v39  ;;  %2245 = vmatprep.subr.bf16.mxu0 %v4307_v41  ;;  %v4385_v39 = vld [vmem:[#allocation4 + $0x4ac] ss:$16 sps:$4 sm:$0xff]  }
 0x192   :  { %2286 = vmatprep.subr.bf16.mxu1 %v4310_v42  ;;  %v4388_v41 = vld [vmem:[#allocation4 + $0x6ac] ss:$16 sps:$4 sm:$0xff]   ;;  %v4383_v42 = vld [vmem:[#allocation4 + $0x4a8] ss:$16 sps:$4 sm:$0xff]  }
 0x194   :  { %2246 = vmatpush1.bf16.msra.mxu0 %v4305_v43  ;;  %v4386_v43 = vld [vmem:[#allocation4 + $0x6a8] ss:$16 sps:$4 sm:$0xff]  }
 0x195   :  { %2287 = vmatpush1.bf16.msra.mxu1 %v4308_v44  ;;  %2247 = vmatprep.subr.bf16.mxu0 %v4313_v45  ;;  %v4391_v44 = vld [vmem:[#allocation4 + $0x4cc] ss:$16 sps:$4 sm:$0xff]  }
 0x196   :  { %2288 = vmatprep.subr.bf16.mxu1 %v4316_v52  ;;  %v4394_v45 = vld [vmem:[#allocation4 + $0x6cc] ss:$16 sps:$4 sm:$0xff]   ;;  %v4389_v52 = vld [vmem:[#allocation4 + $0x4c8] ss:$16 sps:$4 sm:$0xff]  }
 0x198   :  { %2248 = vmatpush1.bf16.msra.mxu0 %v4311_v53  ;;  %v4392_v53 = vld [vmem:[#allocation4 + $0x6c8] ss:$16 sps:$4 sm:$0xff]  }
 0x199   :  { %2289 = vmatpush1.bf16.msra.mxu1 %v4314_v54  ;;  %2249 = vmatprep.subr.bf16.mxu0 %v4319_v55  ;;  %v4397_v54 = vld [vmem:[#allocation4 + $0x4ec] ss:$16 sps:$4 sm:$0xff]  }
 0x19a   :  { %2290 = vmatprep.subr.bf16.mxu1 %v4322_v57  ;;  %v4400_v55 = vld [vmem:[#allocation4 + $0x6ec] ss:$16 sps:$4 sm:$0xff]   ;;  %v4395_v57 = vld [vmem:[#allocation4 + $0x4e8] ss:$16 sps:$4 sm:$0xff]  }
 0x19c   :  { %2250 = vmatpush1.bf16.msra.mxu0 %v4317_v58  ;;  %v4398_v58 = vld [vmem:[#allocation4 + $0x6e8] ss:$16 sps:$4 sm:$0xff]  }
 0x19d   :  { %2291 = vmatpush1.bf16.msra.mxu1 %v4320_v59  ;;  %2251 = vmatprep.subr.bf16.mxu0 %v4325_v62  ;;  %v4403_v59 = vld [vmem:[#allocation4 + $0x50c] ss:$16 sps:$4 sm:$0xff]  }
 0x19e   :  { %2292 = vmatprep.subr.bf16.mxu1 %v4328_v63  ;;  %v4406_v62 = vld [vmem:[#allocation4 + $0x70c] ss:$16 sps:$4 sm:$0xff]   ;;  %v4401_v63 = vld [vmem:[#allocation4 + $0x508] ss:$16 sps:$4 sm:$0xff]  }
 0x1a0   :  { %2252 = vmatpush1.bf16.msra.mxu0 %v4323_v48  ;;  %v4404_v48 = vld [vmem:[#allocation4 + $0x708] ss:$16 sps:$4 sm:$0xff]  }
 0x1a1   :  { %2293 = vmatpush1.bf16.msra.mxu1 %v4326_v1  ;;  %2253 = vmatprep.subr.bf16.mxu0 %v4331_v2  ;;  %v4409_v1 = vld [vmem:[#allocation4 + $0x52c] ss:$16 sps:$4 sm:$0xff]  }
 0x1a2   :  { %2294 = vmatprep.subr.bf16.mxu1 %v4334_v3  ;;  %v4412_v2 = vld [vmem:[#allocation4 + $0x72c] ss:$16 sps:$4 sm:$0xff]   ;;  %v4407_v3 = vld [vmem:[#allocation4 + $0x528] ss:$16 sps:$4 sm:$0xff]  }
 0x1a4   :  { %2254 = vmatpush1.bf16.msra.mxu0 %v4329_v20  ;;  %v4410_v20 = vld [vmem:[#allocation4 + $0x728] ss:$16 sps:$4 sm:$0xff]  }
 0x1a5   :  { %2295 = vmatpush1.bf16.msra.mxu1 %v4332_v5  ;;  %2255 = vmatprep.subr.bf16.mxu0 %v4337_v6  ;;  %v4415_v5 = vld [vmem:[#allocation4 + $0x54c] ss:$16 sps:$4 sm:$0xff]  }
 0x1a6   :  { %2296 = vmatprep.subr.bf16.mxu1 %v4340_v7  ;;  %v4418_v6 = vld [vmem:[#allocation4 + $0x74c] ss:$16 sps:$4 sm:$0xff]   ;;  %v4413_v7 = vld [vmem:[#allocation4 + $0x548] ss:$16 sps:$4 sm:$0xff]  }
 0x1a8   :  { %2256 = vmatpush1.bf16.msra.mxu0 %v4335_v8  ;;  %v4416_v8 = vld [vmem:[#allocation4 + $0x748] ss:$16 sps:$4 sm:$0xff]  }
 0x1a9   :  { %2297 = vmatpush1.bf16.msra.mxu1 %v4338_v9  ;;  %2257 = vmatprep.subr.bf16.mxu0 %v4343_v12  ;;  %v4421_v9 = vld [vmem:[#allocation4 + $0x56c] ss:$16 sps:$4 sm:$0xff]  }
 0x1aa   :  { %2298 = vmatprep.subr.bf16.mxu1 %v4346_v13  ;;  %v4424_v12 = vld [vmem:[#allocation4 + $0x76c] ss:$16 sps:$4 sm:$0xff]   ;;  %v4419_v13 = vld [vmem:[#allocation4 + $0x568] ss:$16 sps:$4 sm:$0xff]  }
 0x1ac   :  { %2258 = vmatpush1.bf16.msra.mxu0 %v4341_v16  ;;  %v4422_v16 = vld [vmem:[#allocation4 + $0x768] ss:$16 sps:$4 sm:$0xff]  }
 0x1ad   :  { %2299 = vmatpush1.bf16.msra.mxu1 %v4344_v17  ;;  %2259 = vmatprep.subr.bf16.mxu0 %v4349_v18  ;;  %v4427_v17 = vld [vmem:[#allocation4 + $0x58c] ss:$16 sps:$4 sm:$0xff]  }
 0x1ae   :  { %2300 = vmatprep.subr.bf16.mxu1 %v4352_v19  ;;  %v4430_v18 = vld [vmem:[#allocation4 + $0x78c] ss:$16 sps:$4 sm:$0xff]   ;;  %v4425_v19 = vld [vmem:[#allocation4 + $0x588] ss:$16 sps:$4 sm:$0xff]  }
 0x1b0   :  { %2260 = vmatpush1.bf16.msra.mxu0 %v4347_v21  ;;  %v4428_v21 = vld [vmem:[#allocation4 + $0x788] ss:$16 sps:$4 sm:$0xff]  }
 0x1b1   :  { %2301 = vmatpush1.bf16.msra.mxu1 %v4350_v23  ;;  %2311 = vmatprep.subr.bf16.mxu0 %v4355_v11  ;;  %v4433_v23 = vld [vmem:[#allocation4 + $0x5ac] ss:$16 sps:$4 sm:$0xff]  }
 0x1b2   :  { %2352 = vmatprep.subr.bf16.mxu1 %v4358_v24  ;;  %v4436_v11 = vld [vmem:[#allocation4 + $0x7ac] ss:$16 sps:$4 sm:$0xff]   ;;  %v4431_v24 = vld [vmem:[#allocation4 + $0x5a8] ss:$16 sps:$4 sm:$0xff]  }
 0x1b3   :  { %2262 = vmatmul.mubr.bf16.vlgmr.msra.gmra.mrb[20].mxu0 %v4873_v14  ;;  %v4368_v14 = vld [vmem:[#allocation4 + $0x648] ss:$16 sps:$4 sm:$0xff]  }
 0x1b4   :  { %2303 = vmatmul.mubr.bf16.vlgmr.msra.gmra.mrb[20].mxu1 %v4868_v10  ;;  %2312 = vmatpush1.bf16.msra.mxu0 %v4353_v25  ;;  %v4376_v10 = vld [vmem:[#allocation4 + $0x66c] ss:$16 sps:$4 sm:$0xff]   ;;  %v4434_v25 = vld [vmem:[#allocation4 + $0x7a8] ss:$16 sps:$4 sm:$0xff]  }
 0x1b5   :  { %2343 = vmatprep.mubr.bf16.mxu0 %v4886_v37  ;;  %2353 = vmatpush1.bf16.msra.mxu1 %v4356_v15  ;;  %v4374_v37 = vld [vmem:[#allocation4 + $0x668] ss:$16 sps:$4 sm:$0xff]   ;;  %v4439_v15 = vld [vmem:[#allocation4 + $0x5cc] ss:$16 sps:$4 sm:$0xff]  }
 0x1b6   :  { %2384 = vmatprep.mubr.bf16.mxu1 %v4888_v40  ;;  %2313 = vmatprep.subr.bf16.mxu0 %v4361_v26  ;;  %v4377_v40 = vld [vmem:[#allocation4 + $0x488] ss:$16 sps:$4 sm:$0xff]   ;;  %v4442_v26 = vld [vmem:[#allocation4 + $0x7cc] ss:$16 sps:$4 sm:$0xff]  }
 0x1b7   :  { %2354 = vmatprep.subr.bf16.mxu1 %v4364_v27  ;;  %v4437_v27 = vld [vmem:[#allocation4 + $0x5c8] ss:$16 sps:$4 sm:$0xff]  }
 0x1b8   :  { %2314 = vmatpush1.bf16.msra.mxu0 %v4359_v28  ;;  %v4440_v28 = vld [vmem:[#allocation4 + $0x7c8] ss:$16 sps:$4 sm:$0xff]  }
 0x1b9   :  { %2355 = vmatpush1.bf16.msra.mxu1 %v4362_v29  ;;  %2315 = vmatprep.subr.bf16.mxu0 %v4367_v30  ;;  %v4445_v29 = vld [vmem:[#allocation4 + $0x5ec] ss:$16 sps:$4 sm:$0xff]  }
 0x1ba   :  { %2356 = vmatprep.subr.bf16.mxu1 %v4370_v31  ;;  %v4448_v30 = vld [vmem:[#allocation4 + $0x7ec] ss:$16 sps:$4 sm:$0xff]   ;;  %v4443_v31 = vld [vmem:[#allocation4 + $0x5e8] ss:$16 sps:$4 sm:$0xff]  }
 0x1bc   :  { %2316 = vmatpush1.bf16.msra.mxu0 %v4365_v32  ;;  %v4446_v32 = vld [vmem:[#allocation4 + $0x7e8] ss:$16 sps:$4 sm:$0xff]  }
 0x1bd   :  { %2357 = vmatpush1.bf16.msra.mxu1 %v4368_v14  ;;  %2317 = vmatprep.subr.bf16.mxu0 %v4373_v33  ;;  %v4451_v14 = vld [vmem:[#allocation6 + $0x4] ss:$12 sps:$4 sm:$0xff]   ;;  %v4476_v33 = vld [vmem:[#allocation6 + $0xc8] ss:$12 sps:$4 sm:$0xff]  }
 0x1be   :  { %2358 = vmatprep.subr.bf16.mxu1 %v4376_v10  ;;  %v4449_v10 = vld [vmem:[#allocation6] ss:$12 sps:$4 sm:$0xff]  }
 0x1c0   :  { %2318 = vmatpush1.bf16.msra.mxu0 %v4371_v34  ;;  %v4454_v34 = vld [vmem:[#allocation6 + $0x1c] ss:$12 sps:$4 sm:$0xff]  }
 0x1c1   :  { %2359 = vmatpush1.bf16.msra.mxu1 %v4374_v37  ;;  %2319 = vmatprep.subr.bf16.mxu0 %v4379_v35  ;;  %v4477_v37 = vld [vmem:[#allocation6 + $0x8] ss:$12 sps:$4 sm:$0xff]   ;;  %v4481_v35 = vld [vmem:[#allocation6 + $0xe0] ss:$12 sps:$4 sm:$0xff]  }
 0x1c2   :  { %2360 = vmatprep.subr.bf16.mxu1 %v4382_v36  ;;  %v4452_v36 = vld [vmem:[#allocation6 + $0x18] ss:$12 sps:$4 sm:$0xff]  }
 0x1c4   :  { %2320 = vmatpush1.bf16.msra.mxu0 %v4377_v40  ;;  %v4457_v40 = vld [vmem:[#allocation6 + $0x34] ss:$12 sps:$4 sm:$0xff]  }
 0x1c5   :  { %2361 = vmatpush1.bf16.msra.mxu1 %v4380_v38  ;;  %2321 = vmatprep.subr.bf16.mxu0 %v4385_v39  ;;  %v4482_v38 = vld [vmem:[#allocation6 + $0x20] ss:$12 sps:$4 sm:$0xff]   ;;  %v4486_v39 = vld [vmem:[#allocation6 + $0xf8] ss:$12 sps:$4 sm:$0xff]  }
 0x1c6   :  { %2362 = vmatprep.subr.bf16.mxu1 %v4388_v41  ;;  %v4455_v41 = vld [vmem:[#allocation6 + $0x30] ss:$12 sps:$4 sm:$0xff]  }
 0x1c8   :  { %2322 = vmatpush1.bf16.msra.mxu0 %v4383_v42  ;;  %v4460_v42 = vld [vmem:[#allocation6 + $0x4c] ss:$12 sps:$4 sm:$0xff]  }
 0x1c9   :  { %2363 = vmatpush1.bf16.msra.mxu1 %v4386_v43  ;;  %2323 = vmatprep.subr.bf16.mxu0 %v4391_v44  ;;  %v4487_v43 = vld [vmem:[#allocation6 + $0x38] ss:$12 sps:$4 sm:$0xff]   ;;  %v4491_v44 = vld [vmem:[#allocation6 + $0x110] ss:$12 sps:$4 sm:$0xff]  }
 0x1ca   :  { %2364 = vmatprep.subr.bf16.mxu1 %v4394_v45  ;;  %v4492_v45 = vld [vmem:[#allocation6 + $0x50] ss:$12 sps:$4 sm:$0xff]  }
 0x1cc   :  { %2324 = vmatpush1.bf16.msra.mxu0 %v4389_v52  ;;  %v4496_v52 = vld [vmem:[#allocation6 + $0x128] ss:$12 sps:$4 sm:$0xff]  }
 0x1cd   :  { %2365 = vmatpush1.bf16.msra.mxu1 %v4392_v53  ;;  %2325 = vmatprep.subr.bf16.mxu0 %v4397_v54  ;;  %v4461_v53 = vld [vmem:[#allocation6 + $0x60] ss:$12 sps:$4 sm:$0xff]   ;;  %v4466_v54 = vld [vmem:[#allocation6 + $0x7c] ss:$12 sps:$4 sm:$0xff]  }
 0x1ce   :  { %2366 = vmatprep.subr.bf16.mxu1 %v4400_v55  ;;  %v4497_v55 = vld [vmem:[#allocation6 + $0x68] ss:$12 sps:$4 sm:$0xff]  }
 0x1d0   :  { %2326 = vmatpush1.bf16.msra.mxu0 %v4395_v57  ;;  %v4501_v57 = vld [vmem:[#allocation6 + $0x140] ss:$12 sps:$4 sm:$0xff]  }
 0x1d1   :  { %2367 = vmatpush1.bf16.msra.mxu1 %v4398_v58  ;;  %2327 = vmatprep.subr.bf16.mxu0 %v4403_v59  ;;  %v4464_v58 = vld [vmem:[#allocation6 + $0x78] ss:$12 sps:$4 sm:$0xff]   ;;  %v4469_v59 = vld [vmem:[#allocation6 + $0x94] ss:$12 sps:$4 sm:$0xff]  }
 0x1d2   :  { %2368 = vmatprep.subr.bf16.mxu1 %v4406_v62  ;;  %v4502_v62 = vld [vmem:[#allocation6 + $0x80] ss:$12 sps:$4 sm:$0xff]  }
 0x1d4   :  { %2328 = vmatpush1.bf16.msra.mxu0 %v4401_v63 }
 0x1d5   :  { %2369 = vmatpush1.bf16.msra.mxu1 %v4404_v48  ;;  %2329 = vmatprep.subr.bf16.mxu0 %v4409_v1  ;;  %v4506_v48 = vld [vmem:[#allocation6 + $0x158] ss:$12 sps:$4 sm:$0xff]  }
 0x1d6   :  { %2370 = vmatprep.subr.bf16.mxu1 %v4412_v2 }
 0x1d8   :  { %2330 = vmatpush1.bf16.msra.mxu0 %v4407_v3 }
 0x1d9   :  { %2371 = vmatpush1.bf16.msra.mxu1 %v4410_v20  ;;  %2331 = vmatprep.subr.bf16.mxu0 %v4415_v5 }
 0x1da   :  { %2372 = vmatprep.subr.bf16.mxu1 %v4418_v6 }
 0x1dc   :  { %2332 = vmatpush1.bf16.msra.mxu0 %v4413_v7  ;;  %v4467_v7 = vld [vmem:[#allocation6 + $0x90] ss:$12 sps:$4 sm:$0xff]  }
 0x1dd   :  { %2373 = vmatpush1.bf16.msra.mxu1 %v4416_v8  ;;  %2333 = vmatprep.subr.bf16.mxu0 %v4421_v9 }
 0x1de   :  { %2374 = vmatprep.subr.bf16.mxu1 %v4424_v12 }
 0x1e0   :  { %2334 = vmatpush1.bf16.msra.mxu0 %v4419_v13  ;;  %v4472_v13 = vld [vmem:[#allocation6 + $0xac] ss:$12 sps:$4 sm:$0xff]  }
 0x1e1   :  { %2375 = vmatpush1.bf16.msra.mxu1 %v4422_v16  ;;  %2335 = vmatprep.subr.bf16.mxu0 %v4427_v17  ;;  %v4507_v16 = vld [vmem:[#allocation6 + $0x98] ss:$12 sps:$4 sm:$0xff]  }
 0x1e2   :  { %2376 = vmatprep.subr.bf16.mxu1 %v4430_v18 }
 0x1e4   :  { %2336 = vmatpush1.bf16.msra.mxu0 %v4425_v19  ;;  %v4511_v19 = vld [vmem:[#allocation6 + $0x170] ss:$12 sps:$4 sm:$0xff]  }
 0x1e5   :  { %2377 = vmatpush1.bf16.msra.mxu1 %v4428_v21  ;;  %2337 = vmatprep.subr.bf16.mxu0 %v4433_v23  ;;  %v4475_v21 = vld [vmem:[#allocation6 + $0xc4] ss:$12 sps:$4 sm:$0xff]   ;;  %v4473_v23 = vld [vmem:[#allocation6 + $0xc0] ss:$12 sps:$4 sm:$0xff]  }
 0x1e6   :  { %2378 = vmatprep.subr.bf16.mxu1 %v4436_v11  ;;  %v4540_v11 = vld [vmem:[#allocation6 + $0x248] ss:$12 sps:$4 sm:$0xff]  }
 0x1e8   :  { %2338 = vmatpush1.bf16.msra.mxu0 %v4431_v24  ;;  %v4480_v24 = vld [vmem:[#allocation6 + $0xdc] ss:$12 sps:$4 sm:$0xff]  }
 0x1e9   :  { %2379 = vmatpush1.bf16.msra.mxu1 %v4434_v25  ;;  %2339 = vmatprep.subr.bf16.mxu0 %v4439_v15  ;;  %v4478_v25 = vld [vmem:[#allocation6 + $0xd8] ss:$12 sps:$4 sm:$0xff]   ;;  %v4485_v15 = vld [vmem:[#allocation6 + $0xf4] ss:$12 sps:$4 sm:$0xff]  }
 0x1ea   :  { %2380 = vmatprep.subr.bf16.mxu1 %v4442_v26  ;;  %v4483_v26 = vld [vmem:[#allocation6 + $0xf0] ss:$12 sps:$4 sm:$0xff]  }
 0x1ec   :  { %2340 = vmatpush1.bf16.msra.mxu0 %v4437_v27  ;;  %v4490_v27 = vld [vmem:[#allocation6 + $0x10c] ss:$12 sps:$4 sm:$0xff]  }
 0x1ed   :  { %2381 = vmatpush1.bf16.msra.mxu1 %v4440_v28  ;;  %2341 = vmatprep.subr.bf16.mxu0 %v4445_v29  ;;  %v4488_v28 = vld [vmem:[#allocation6 + $0x108] ss:$12 sps:$4 sm:$0xff]   ;;  %v4495_v29 = vld [vmem:[#allocation6 + $0x124] ss:$12 sps:$4 sm:$0xff]  }
 0x1ee   :  { %2382 = vmatprep.subr.bf16.mxu1 %v4448_v30  ;;  %v4493_v30 = vld [vmem:[#allocation6 + $0x120] ss:$12 sps:$4 sm:$0xff]  }
 0x1f0   :  { %2342 = vmatpush1.bf16.msra.mxu0 %v4443_v31  ;;  %v4500_v31 = vld [vmem:[#allocation6 + $0x13c] ss:$12 sps:$4 sm:$0xff]  }
 0x1f1   :  { %2383 = vmatpush1.bf16.msra.mxu1 %v4446_v32  ;;  %3084 = vmatprep.subr.bf16.mxu0 %v4451_v14  ;;  %v4498_v32 = vld [vmem:[#allocation6 + $0x138] ss:$12 sps:$4 sm:$0xff]   ;;  %v4505_v14 = vld [vmem:[#allocation6 + $0x154] ss:$12 sps:$4 sm:$0xff]  }
 0x1f2   :  { %3945 = vmatprep.subr.bf16.mxu1 %v4476_v33  ;;  %v4503_v33 = vld [vmem:[#allocation6 + $0x150] ss:$12 sps:$4 sm:$0xff]  }
 0x1f3   :  { %2344 = vmatmul.mubr.bf16.vlgmr.msra.gmra.mrb[24].mxu0 %v4906_v4  ;;  %v4458_v4 = vld [vmem:[#allocation6 + $0x48] ss:$12 sps:$4 sm:$0xff]  }
 0x1f4   :  { %2385 = vmatmul.mubr.bf16.vlgmr.msra.gmra.mrb[24].mxu1 %v4908_v22  ;;  %3085 = vmatpush1.bf16.msra.mxu0 %v4449_v10  ;;  %v4463_v22 = vld [vmem:[#allocation6 + $0x64] ss:$12 sps:$4 sm:$0xff]   ;;  %v4510_v10 = vld [vmem:[#allocation6 + $0x16c] ss:$12 sps:$4 sm:$0xff]  }
 0x1f5   :  { %3086 = vmatprep.subr.bf16.mxu0 %v4454_v34  ;;  %3946 = vmatpush3.bf16.msra.mxu1 %v4477_v37  ;;  %v4508_v34 = vld [vmem:[#allocation6 + $0x168] ss:$12 sps:$4 sm:$0xff]   ;;  %v4515_v37 = vld [vmem:[#allocation6 + $0x184] ss:$12 sps:$4 sm:$0xff]  }
 0x1f6   :  { %3947 = vmatprep.subr.bf16.mxu1 %v4481_v35  ;;  %v4925_v35 = vld [vmem:[%s4956_s6] sm:$0xf] }
 0x1f8   :  { %3087 = vmatpush1.bf16.msra.mxu0 %v4452_v36 }
 0x1f9   :  { %3088 = vmatprep.subr.bf16.mxu0 %v4457_v40  ;;  %3948 = vmatpush3.bf16.msra.mxu1 %v4482_v38 }
 0x1fa   :  { %3949 = vmatprep.subr.bf16.mxu1 %v4486_v39  ;;  %v2398_v39 = vrot.slane %v4925_v35, %v4843_v47 }
 0x1fc   :  { %3089 = vmatpush1.bf16.msra.mxu0 %v4455_v41 }
 0x1fd   :  { %3090 = vmatprep.subr.bf16.mxu0 %v4460_v42  ;;  %3950 = vmatpush3.bf16.msra.mxu1 %v4487_v43 }
 0x1fe   :  { %3951 = vmatprep.subr.bf16.mxu1 %v4491_v44  ;;  %v2402_v44 = vrot.slane %v4925_v35, %v4854_v50 }
 0x200   :  { %3091 = vmatpush1.bf16.msra.mxu0 %v4458_v4 }
 0x201   :  { %3092 = vmatprep.subr.bf16.mxu0 %v4463_v22  ;;  %3952 = vmatpush3.bf16.msra.mxu1 %v4492_v45 }
 0x202   :  { %3953 = vmatprep.subr.bf16.mxu1 %v4496_v52 }
 0x204   :  { %3093 = vmatpush1.bf16.msra.mxu0 %v4461_v53 }
 0x205   :  { %3094 = vmatprep.subr.bf16.mxu0 %v4466_v54  ;;  %3954 = vmatpush3.bf16.msra.mxu1 %v4497_v55 }
 0x206   :  { %v2099_v63 = vpop.f32.mrb[12].mxu0  ;;  %3955 = vmatprep.subr.bf16.mxu1 %v4501_v57  ;;  %v2140_v2 = vpop.f32.mrb[12].mxu1 }
 0x207   :  { %v2100_v1 = vadd.f32 %v2099_v63, %v4892_v56  ;;  %v2101_v3 = vpop.f32.mrb[13].mxu0  ;;  %v2142_v5 = vpop.f32.mrb[13].mxu1  ;;  %v4470_v56 = vld [vmem:[#allocation6 + $0xa8] ss:$12 sps:$4 sm:$0xff]   ;;  %v4513_v63 = vld [vmem:[#allocation6 + $0x180] ss:$12 sps:$4 sm:$0xff]  }
 0x208   :  { %v2102_v20 = vadd.f32 %v2101_v3, %v4894_v60  ;;  %v2103_v6 = vpop.f32.mrb[14].mxu0  ;;  %3095 = vmatpush1.bf16.msra.mxu0 %v4464_v58  ;;  %v2144_v9 = vpop.f32.mrb[14].mxu1  ;;  %v4512_v60 = vld [vmem:[#allocation6 + $0xb0] ss:$12 sps:$4 sm:$0xff]   ;;  %v4545_v3 = vld [vmem:[#allocation6 + $0x260] ss:$12 sps:$4 sm:$0xff]  }
 0x209   :  { %v2141_v8 = vadd.f32 %v2140_v2, %v2100_v1  ;;  %v2104_v12 = vpop.f32.mrb[15].mxu0  ;;  %3096 = vmatprep.subr.bf16.mxu0 %v4469_v59  ;;  %3956 = vmatpush3.bf16.msra.mxu1 %v4502_v62  ;;  %v2145_v18 = vpop.f32.mrb[15].mxu1  ;;  %v4518_v2 = vld [vmem:[#allocation6 + $0x19c] ss:$12 sps:$4 sm:$0xff]   ;;  %v4521_v6 = vld [vmem:[#allocation6 + $0x1b4] ss:$12 sps:$4 sm:$0xff]  }
 0x20a   :  { %v2143_v17 = vadd.f32 %v2142_v5, %v2102_v20  ;;  %3957 = vmatprep.subr.bf16.mxu1 %v4506_v48  ;;  %v4541_v48 = vld [vmem:[#allocation6 + $0x188] ss:$12 sps:$4 sm:$0xff]   ;;  %v4516_v20 = vld [vmem:[#allocation6 + $0x198] ss:$12 sps:$4 sm:$0xff]   ;;  %v4546_v5 = vld [vmem:[#allocation6 + $0x1a0] ss:$12 sps:$4 sm:$0xff]  }
 0x20b   :  { %v4551_v9 = vld [vmem:[#allocation6 + $0x1b8] ss:$12 sps:$4 sm:$0xff]  }
 0x20c   :  { %3097 = vmatpush1.bf16.msra.mxu0 %v4467_v7  ;;  %v4550_v7 = vld [vmem:[#allocation6 + $0x278] ss:$12 sps:$4 sm:$0xff]  }
 0x20d   :  { %3098 = vmatprep.subr.bf16.mxu0 %v4472_v13  ;;  %3958 = vmatpush3.bf16.msra.mxu1 %v4507_v16  ;;  %v4524_v12 = vld [vmem:[#allocation6 + $0x1cc] ss:$12 sps:$4 sm:$0xff]   ;;  %v4555_v13 = vld [vmem:[#allocation6 + $0x290] ss:$12 sps:$4 sm:$0xff]   ;;  %v4522_v16 = vld [vmem:[#allocation6 + $0x1c8] ss:$12 sps:$4 sm:$0xff]  }
 0x20e   :  { %3959 = vmatprep.subr.bf16.mxu1 %v4511_v19  ;;  %v4527_v18 = vld [vmem:[#allocation6 + $0x1e4] ss:$12 sps:$4 sm:$0xff]   ;;  %v4560_v19 = vld [vmem:[#allocation6 + $0x2a8] ss:$12 sps:$4 sm:$0xff]  }
 0x210   :  { %3099 = vmatpush1.bf16.msra.mxu0 %v4470_v56  ;;  %v4525_v56 = vld [vmem:[#allocation6 + $0x1e0] ss:$12 sps:$4 sm:$0xff]  }
 0x211   :  { %3100 = vmatprep.subr.bf16.mxu0 %v4475_v21  ;;  %3960 = vmatpush3.bf16.msra.mxu1 %v4512_v60  ;;  %v4561_v21 = vld [vmem:[#allocation6 + $0x1e8] ss:$12 sps:$4 sm:$0xff]  }
 0x212   :  { %3967 = vmatprep.subr.bf16.mxu1 %v4540_v11  ;;  %v4530_v60 = vld [vmem:[#allocation6 + $0x1fc] ss:$12 sps:$4 sm:$0xff]   ;;  %v4528_v11 = vld [vmem:[#allocation6 + $0x1f8] ss:$12 sps:$4 sm:$0xff]  }
 0x214   :  { %3101 = vmatpush1.bf16.msra.mxu0 %v4473_v23  ;;  %v4565_v23 = vld [vmem:[#allocation6 + $0x2c0] ss:$12 sps:$4 sm:$0xff]  }
 0x215   :  { %3102 = vmatprep.subr.bf16.mxu0 %v4480_v24  ;;  %v4566_v24 = vld [vmem:[#allocation6 + $0x200] ss:$12 sps:$4 sm:$0xff]  }
 0x218   :  { %3103 = vmatpush1.bf16.msra.mxu0 %v4478_v25  ;;  %v4533_v25 = vld [vmem:[#allocation6 + $0x214] ss:$12 sps:$4 sm:$0xff]  }
 0x219   :  { %3104 = vmatprep.subr.bf16.mxu0 %v4485_v15  ;;  %v4570_v15 = vld [vmem:[#allocation6 + $0x2d8] ss:$12 sps:$4 sm:$0xff]  }
 0x21c   :  { %3105 = vmatpush1.bf16.msra.mxu0 %v4483_v26  ;;  %v4531_v26 = vld [vmem:[#allocation6 + $0x210] ss:$12 sps:$4 sm:$0xff]  }
 0x21d   :  { %3106 = vmatprep.subr.bf16.mxu0 %v4490_v27  ;;  %v4571_v27 = vld [vmem:[#allocation6 + $0x218] ss:$12 sps:$4 sm:$0xff]  }
 0x220   :  { %3107 = vmatpush1.bf16.msra.mxu0 %v4488_v28  ;;  %v4536_v28 = vld [vmem:[#allocation6 + $0x22c] ss:$12 sps:$4 sm:$0xff]  }
 0x221   :  { %3108 = vmatprep.subr.bf16.mxu0 %v4495_v29  ;;  %v4575_v29 = vld [vmem:[#allocation6 + $0x2f0] ss:$12 sps:$4 sm:$0xff]  }
 0x224   :  { %3109 = vmatpush1.bf16.msra.mxu0 %v4493_v30  ;;  %v4534_v30 = vld [vmem:[#allocation6 + $0x228] ss:$12 sps:$4 sm:$0xff]  }
 0x225   :  { %3110 = vmatprep.subr.bf16.mxu0 %v4500_v31  ;;  %v4576_v31 = vld [vmem:[#allocation6 + $0x230] ss:$12 sps:$4 sm:$0xff]  }
 0x228   :  { %3111 = vmatpush1.bf16.msra.mxu0 %v4498_v32  ;;  %v4539_v32 = vld [vmem:[#allocation6 + $0x244] ss:$12 sps:$4 sm:$0xff]  }
 0x229   :  { %3112 = vmatprep.subr.bf16.mxu0 %v4505_v14  ;;  %v4537_v14 = vld [vmem:[#allocation6 + $0x240] ss:$12 sps:$4 sm:$0xff]  }
 0x22c   :  { %3113 = vmatpush1.bf16.msra.mxu0 %v4503_v33  ;;  %v4544_v33 = vld [vmem:[#allocation6 + $0x25c] ss:$12 sps:$4 sm:$0xff]  }
 0x22d   :  { %3114 = vmatprep.subr.bf16.mxu0 %v4510_v10  ;;  %v4542_v10 = vld [vmem:[#allocation6 + $0x258] ss:$12 sps:$4 sm:$0xff]  }
 0x230   :  { %3115 = vmatpush1.bf16.msra.mxu0 %v4508_v34  ;;  %v4549_v34 = vld [vmem:[#allocation6 + $0x274] ss:$12 sps:$4 sm:$0xff]  }
 0x231   :  { %3125 = vmatprep.subr.bf16.mxu0 %v4515_v37  ;;  %v4547_v37 = vld [vmem:[#allocation6 + $0x270] ss:$12 sps:$4 sm:$0xff]  }
 0x246   :  { %v2181_v36 = vpop.f32.mrb[16].mxu0  ;;  %v2222_v38 = vpop.f32.mrb[16].mxu1 }
 0x247   :  { %v2182_v40 = vadd.f32 %v2181_v36, %v2141_v8  ;;  %v2183_v41 = vpop.f32.mrb[17].mxu0  ;;  %v2224_v43 = vpop.f32.mrb[17].mxu1  ;;  %v4519_v8 = vld [vmem:[#allocation6 + $0x1b0] ss:$12 sps:$4 sm:$0xff]   ;;  %v4554_v36 = vld [vmem:[#allocation6 + $0x28c] ss:$12 sps:$4 sm:$0xff]  }
 0x248   :  { %v2184_v42 = vadd.f32 %v2183_v41, %v2143_v17  ;;  %v2185_v4 = vpop.f32.mrb[18].mxu0  ;;  %v2226_v45 = vpop.f32.mrb[18].mxu1  ;;  %v4556_v17 = vld [vmem:[#allocation6 + $0x1d0] ss:$12 sps:$4 sm:$0xff]  }
 0x249   :  { %v2223_v22 = vadd.f32 %v2222_v38, %v2182_v40  ;;  %v2186_v52 = vpop.f32.mrb[19].mxu0  ;;  %v2227_v54 = vpop.f32.mrb[19].mxu1  ;;  %v4552_v40 = vld [vmem:[#allocation6 + $0x288] ss:$12 sps:$4 sm:$0xff]   ;;  %v4559_v38 = vld [vmem:[#allocation6 + $0x2a4] ss:$12 sps:$4 sm:$0xff]  }
 0x24a   :  { %v2225_v53 = vadd.f32 %v2224_v43, %v2184_v42  ;;  %v4564_v41 = vld [vmem:[#allocation6 + $0x2bc] ss:$12 sps:$4 sm:$0xff]   ;;  %v4562_v42 = vld [vmem:[#allocation6 + $0x2b8] ss:$12 sps:$4 sm:$0xff]   ;;  %v4569_v43 = vld [vmem:[#allocation6 + $0x2d4] ss:$12 sps:$4 sm:$0xff]  }
 0x24b   :  { %v2415_v55 = vadd.f32 %v2398_v39, %v2223_v22  ;;  %v4557_v39 = vld [vmem:[#allocation6 + $0x2a0] ss:$12 sps:$4 sm:$0xff]  }
 0x24c   :  { %v2416_v57 = vadd.f32 %v2402_v44, %v2225_v53 }
 0x24d   :  { %v2419_v58 = vmax.f32 %v2415_v55, 0.0  ;;  %v4567_v55 = vld [vmem:[#allocation6 + $0x2d0] ss:$12 sps:$4 sm:$0xff]  }
 0x24e   :  { %v2420_v59 = vmax.f32 %v2416_v57, 0.0 }
 0x24f   :  { %v2423_v1 = vpack.c.bf16 %v2419_v58, %v2419_v58 }
 0x250   :  { %v2424_v62 = vpack.c.bf16 %v2420_v59, %v2420_v59 }
 0x252   :  { %3116 = vmatprep.mubr.bf16.mxu0 %v2424_v62  ;;  %3198 = vmatprep.mubr.bf16.mxu1 %v2424_v62  ;;  %v4574_v62 = vld [vmem:[#allocation6 + $0x2ec] ss:$12 sps:$4 sm:$0xff]  }
 0x253   :  { %3117 = vmatmul.mubr.bf16.vlgmr.msra.gmra.mrb[28].mxu0 %v2423_v1  ;;  %3199 = vmatmul.mubr.bf16.vlgmr.msra.gmra.mrb[28].mxu1 %v2423_v1  ;;  %v4572_v1 = vld [vmem:[#allocation6 + $0x2e8] ss:$12 sps:$4 sm:$0xff]  }
 0x254   :  { %3126 = vmatpush1.bf16.msra.mxu0 %v4513_v63  ;;  %3968 = vmatpush3.bf16.msra.mxu1 %v4541_v48 }
 0x255   :  { %3127 = vmatprep.subr.bf16.mxu0 %v4518_v2  ;;  %3969 = vmatprep.subr.bf16.mxu1 %v4545_v3 }
 0x258   :  { %3128 = vmatpush1.bf16.msra.mxu0 %v4516_v20  ;;  %3970 = vmatpush3.bf16.msra.mxu1 %v4546_v5  ;;  %v2406_v20 = vrot.slane %v4925_v35, %v4851_v49 }
 0x259   :  { %3129 = vmatprep.subr.bf16.mxu0 %v4521_v6  ;;  %3971 = vmatprep.subr.bf16.mxu1 %v4550_v7 }
 0x25c   :  { %3130 = vmatpush1.bf16.msra.mxu0 %v4519_v8  ;;  %3972 = vmatpush3.bf16.msra.mxu1 %v4551_v9  ;;  %v2410_v8 = vrot.slane %v4925_v35, %v128_v51  ;;  %v4581_v51 = vld [vmem:[#allocation7 + $0x50] sm:$0xff]  }
 0x25d   :  { %3131 = vmatprep.subr.bf16.mxu0 %v4524_v12  ;;  %3973 = vmatprep.subr.bf16.mxu1 %v4555_v13  ;;  %v4582_v35 = vld [vmem:[#allocation7 + $0x10] sm:$0xff]  }
 0x260   :  { %3132 = vmatpush1.bf16.msra.mxu0 %v4522_v16  ;;  %3974 = vmatpush3.bf16.msra.mxu1 %v4556_v17 }
 0x261   :  { %3133 = vmatprep.subr.bf16.mxu0 %v4527_v18  ;;  %3975 = vmatprep.subr.bf16.mxu1 %v4560_v19 }
 0x264   :  { %3134 = vmatpush1.bf16.msra.mxu0 %v4525_v56  ;;  %3976 = vmatpush3.bf16.msra.mxu1 %v4561_v21 }
 0x265   :  { %3135 = vmatprep.subr.bf16.mxu0 %v4530_v60  ;;  %3977 = vmatprep.subr.bf16.mxu1 %v4565_v23 }
 0x268   :  { %3136 = vmatpush1.bf16.msra.mxu0 %v4528_v11  ;;  %3978 = vmatpush3.bf16.msra.mxu1 %v4566_v24  ;;  %v4578_v11 = vld [vmem:[#allocation7] sm:$0xff]  }
 0x269   :  { %3137 = vmatprep.subr.bf16.mxu0 %v4533_v25  ;;  %3979 = vmatprep.subr.bf16.mxu1 %v4570_v15  ;;  %v4579_v25 = vld [vmem:[#allocation7 + $0x48] sm:$0xff]   ;;  %v4583_v15 = vld [vmem:[#allocation7 + $0x58] sm:$0xff]  }
 0x26c   :  { %3138 = vmatpush1.bf16.msra.mxu0 %v4531_v26  ;;  %3980 = vmatpush3.bf16.msra.mxu1 %v4571_v27  ;;  %v4584_v26 = vld [vmem:[#allocation7 + $0x18] sm:$0xff]   ;;  %v4585_v27 = vld [vmem:[#allocation7 + $0x60] sm:$0xff]  }
 0x26d   :  { %3139 = vmatprep.subr.bf16.mxu0 %v4536_v28  ;;  %3981 = vmatprep.subr.bf16.mxu1 %v4575_v29  ;;  %v4586_v28 = vld [vmem:[#allocation7 + $0x20] sm:$0xff]   ;;  %v4587_v29 = vld [vmem:[#allocation7 + $0x68] sm:$0xff]  }
 0x270   :  { %3140 = vmatpush1.bf16.msra.mxu0 %v4534_v30  ;;  %3982 = vmatpush3.bf16.msra.mxu1 %v4576_v31  ;;  %v4588_v30 = vld [vmem:[#allocation7 + $0x28] sm:$0xff]  }
 0x271   :  { %3141 = vmatprep.subr.bf16.mxu0 %v4539_v32  ;;  %v4589_v32 = vld [vmem:[#allocation7 + $0x70] sm:$0xff]  }
 0x274   :  { %3142 = vmatpush1.bf16.msra.mxu0 %v4537_v14 }
 0x275   :  { %3143 = vmatprep.subr.bf16.mxu0 %v4544_v33  ;;  %v4590_v33 = vld [vmem:[#allocation7 + $0x30] sm:$0xff]  }
 0x278   :  { %3144 = vmatpush1.bf16.msra.mxu0 %v4542_v10 }
 0x279   :  { %3145 = vmatprep.subr.bf16.mxu0 %v4549_v34 }
 0x27c   :  { %3146 = vmatpush1.bf16.msra.mxu0 %v4547_v37 }
 0x27d   :  { %3147 = vmatprep.subr.bf16.mxu0 %v4554_v36  ;;  %v4591_v36 = vld [vmem:[#allocation7 + $0x78] sm:$0xff]  }
 0x280   :  { %3148 = vmatpush1.bf16.msra.mxu0 %v4552_v40  ;;  %v4592_v40 = vld [vmem:[#allocation7 + $0x38] sm:$0xff]  }
 0x281   :  { %3149 = vmatprep.subr.bf16.mxu0 %v4559_v38  ;;  %v4708_v38 = vmov 0.0  }
 0x284   :  { %3150 = vmatpush1.bf16.msra.mxu0 %v4557_v39  ;;  %v2555_v39 = vld [vmem:[%s4958_s8] sm:$0x7] }
 0x285   :  { %3151 = vmatprep.subr.bf16.mxu0 %v4564_v41  ;;  %v2560_v41 = vrot.slane %v2555_v39, %v4843_v47 }
 0x286   :  { %v2263_v44 = vpop.f32.mrb[20].mxu0 }
 0x287   :  { %v2264_v4 = vadd.f32 %v2263_v44, %v4896_v61  ;;  %v2304_v22 = vpop.f32.mrb[20].mxu1  ;;  %v2265_v45 = vpop.f32.mrb[21].mxu0  ;;  %v4577_v61 = vld [vmem:[#allocation7 + $0x40] sm:$0xff]  }
 0x288   :  { %v2266_v52 = vadd.f32 %v2265_v45, %v4898_v0  ;;  %v2306_v53 = vpop.f32.mrb[21].mxu1  ;;  %v2267_v54 = vpop.f32.mrb[22].mxu0  ;;  %3152 = vmatpush1.bf16.msra.mxu0 %v4562_v42  ;;  %3989 = vmatprep.subr.bf16.mxu1 %v4577_v61  ;;  %v2568_v42 = vrot.slane %v2555_v39, %v4851_v49  ;;  %v4593_v61 = vld [vmem:[#allocation7 + $0x80] sm:$0xff]  }
 0x289   :  { %v2305_v57 = vadd.f32 %v2304_v22, %v2264_v4  ;;  %v2308_v58 = vpop.f32.mrb[22].mxu1  ;;  %v2268_v59 = vpop.f32.mrb[23].mxu0  ;;  %3153 = vmatprep.subr.bf16.mxu0 %v4569_v43  ;;  %v2564_v43 = vrot.slane %v2555_v39, %v4854_v50  ;;  %v4594_v50 = vld [vmem:[#allocation7 + $0x88] sm:$0xff]  }
 0x28a   :  { %v2307_v63 = vadd.f32 %v2306_v53, %v2266_v52  ;;  %v2309_v48 = vpop.f32.mrb[23].mxu1 }
 0x28c   :  { %3154 = vmatpush1.bf16.msra.mxu0 %v4567_v55 }
 0x28d   :  { %3155 = vmatprep.subr.bf16.mxu0 %v4574_v62 }
 0x290   :  { %3156 = vmatpush1.bf16.msra.mxu0 %v4572_v1 }
 0x2c6   :  { %v2345_v2 = vpop.f32.mrb[24].mxu0 }
 0x2c7   :  { %v2346_v3 = vadd.f32 %v2345_v2, %v2305_v57  ;;  %v2386_v0 = vpop.f32.mrb[24].mxu1  ;;  %v2347_v5 = vpop.f32.mrb[25].mxu0  ;;  %v4595_v2 = vld [vmem:[#allocation7 + $0x90] sm:$0xff]  }
 0x2c8   :  { %v2348_v6 = vadd.f32 %v2347_v5, %v2307_v63  ;;  %v2388_v7 = vpop.f32.mrb[25].mxu1  ;;  %v2349_v9 = vpop.f32.mrb[26].mxu0  ;;  %v4599_v5 = vld [vmem:[#allocation7 + $0xb0] sm:$0xff]  }
 0x2c9   :  { %v2387_v12 = vadd.f32 %v2386_v0, %v2346_v3  ;;  %v2390_v13 = vpop.f32.mrb[26].mxu1  ;;  %v2350_v16 = vpop.f32.mrb[27].mxu0  ;;  %v4596_v3 = vld [vmem:[#allocation7 + $0x98] sm:$0xff]   ;;  %v4597_v0 = vld [vmem:[#allocation7 + $0xa0] sm:$0xff]  }
 0x2ca   :  { %v2389_v17 = vadd.f32 %v2388_v7, %v2348_v6  ;;  %v2391_v18 = vpop.f32.mrb[27].mxu1  ;;  %v4600_v6 = vld [vmem:[#allocation7 + $0xb8] sm:$0xff]  }
 0x2cb   :  { %v2417_v19 = vadd.f32 %v2406_v20, %v2387_v12  ;;  %v4598_v20 = vld [vmem:[#allocation7 + $0xa8] sm:$0xff]   ;;  %v3920_v18 = vld [vmem:[%s4960_s10] ss:$0 sm:$0xff] }
 0x2cc   :  { %v2418_v56 = vadd.f32 %v2410_v8, %v2389_v17 }
 0x2cd   :  { %v2421_v21 = vmax.f32 %v2417_v19, 0.0 }
 0x2ce   :  { %v2422_v60 = vmax.f32 %v2418_v56, 0.0 }
 0x2cf   :  { %v2425_v24 = vpack.c.bf16 %v2421_v21, %v2421_v21 }
 0x2d0   :  { %v2426_v23 = vpack.c.bf16 %v2422_v60, %v2422_v60 }
 0x2d2   :  { %3157 = vmatprep.mubr.bf16.mxu0 %v2426_v23  ;;  %3238 = vmatprep.mubr.bf16.mxu1 %v2426_v23 }
 0x2d3   :  { %3158 = vmatmul.mubr.bf16.vlgmr.msra.gmra.mrb[28].mxu0 %v2425_v24  ;;  %3239 = vmatmul.mubr.bf16.vlgmr.msra.gmra.mrb[32].mxu1 %v2425_v24 }
 0x2d4   :  { %3990 = vmatpush3.bf16.msra.mxu1 %v4578_v11 }
 0x2d5   :  { %3991 = vmatprep.subr.bf16.mxu1 %v4579_v25 }
 0x2d8   :  { %3992 = vmatpush3.bf16.msra.mxu1 %v4580_v46 }
 0x2d9   :  { %3993 = vmatprep.subr.bf16.mxu1 %v4581_v51 }
 0x2dc   :  { %3994 = vmatpush3.bf16.msra.mxu1 %v4582_v35 }
 0x2dd   :  { %3995 = vmatprep.subr.bf16.mxu1 %v4583_v15 }
 0x2e0   :  { %3996 = vmatpush3.bf16.msra.mxu1 %v4584_v26 }
 0x2e1   :  { %3997 = vmatprep.subr.bf16.mxu1 %v4585_v27 }
 0x2e4   :  { %3998 = vmatpush3.bf16.msra.mxu1 %v4586_v28 }
 0x2e5   :  { %3999 = vmatprep.subr.bf16.mxu1 %v4587_v29 }
 0x2e8   :  { %4000 = vmatpush3.bf16.msra.mxu1 %v4588_v30 }
 0x2e9   :  { %4001 = vmatprep.subr.bf16.mxu1 %v4589_v32 }
 0x2ec   :  { %4002 = vmatpush3.bf16.msra.mxu1 %v4590_v33 }
 0x2ed   :  { %4003 = vmatprep.subr.bf16.mxu1 %v4591_v36 }
 0x2f0   :  { %4004 = vmatpush3.bf16.msra.mxu1 %v4592_v40 }
 0x2f1   :  { %4020 = vmatprep.subr.bf16.mxu1 %v4708_v38 }
 0x326   :  { %v3961_v31 = vpop.f32.mrb[28].mxu1 }
 0x327   :  { %v3962_v14 = vpop.f32.mrb[29].mxu1 }
 0x328   :  { %v3963_v10 = vadd.f32 %v3962_v14, %v3961_v31  ;;  %v3964_v34 = vpop.f32.mrb[30].mxu1 }
 0x329   :  { %v3965_v37 = vpop.f32.mrb[31].mxu1 }
 0x32a   :  { %v3201_v53 = vadd.f32 %v3963_v10, %v2568_v42 }
 0x3a6   :  { %v3159_v44 = vpop.f32.mrb[28].mxu0  ;;  %v3983_v4 = vpop.f32.mrb[32].mxu1 }
 0x3a7   :  { %v4040_v22 = vadd.f32 %v3159_v44, %v2560_v41  ;;  %v3161_v45 = vpop.f32.mrb[29].mxu0  ;;  %v3984_v52 = vpop.f32.mrb[33].mxu1 }
 0x3a8   :  { %v4041_v54 = vadd.f32 %v3161_v45, %v2564_v43  ;;  %v3985_v55 = vadd.f32 %v3984_v52, %v3983_v4  ;;  %v3163_v57 = vpop.f32.mrb[30].mxu0  ;;  %v3986_v58 = vpop.f32.mrb[34].mxu1 }
 0x3a9   :  { %v3246_v59 = vmax.f32 %v4040_v22, 0.0  ;;  %v3164_v62 = vpop.f32.mrb[31].mxu0  ;;  %v3987_v63 = vpop.f32.mrb[35].mxu1 }
 0x3aa   :  { %v3247_v48 = vmax.f32 %v4041_v54, 0.0  ;;  %v3241_v1 = vadd.f32 %v3985_v55, %v3201_v53 }
 0x3ab   :  { %v3249_v49 = vpack.c.bf16 %v3246_v59, %v3246_v59 }
 0x3ac   :  { %v3250_v47 = vpack.c.bf16 %v3247_v48, %v3247_v48  ;;  %v3248_v7 = vmax.f32 %v3241_v1, 0.0 }
 0x3ae   :  { %3483 = vmatprep.mubr.bf16.mxu1 %v3250_v47  ;;  %v3251_v8 = vpack.c.bf16 %v3248_v7, %v3248_v7 }
 0x3af   :  { %3484 = vmatmul.mubr.bf16.vlgmr.msra.gmra.mrb[36].mxu1 %v3249_v49 }
 0x3b0   :  { %4021 = vmatpush3.bf16.msra.mxu1 %v4593_v61  ;;  %4036 = vmatprep.mubr.msk.bf16.mxu1 %vm4709_vm3, %v4708_v38 }
 0x3b1   :  { %4022 = vmatprep.subr.bf16.mxu1 %v4708_v38 }
 0x3b4   :  { %4023 = vmatpush3.bf16.msra.mxu1 %v4594_v50 }
 0x3b5   :  { %4024 = vmatprep.subr.bf16.mxu1 %v4708_v38 }
 0x3b8   :  { %4025 = vmatpush3.bf16.msra.mxu1 %v4595_v2 }
 0x3b9   :  { %4026 = vmatprep.subr.bf16.mxu1 %v4708_v38 }
 0x3bc   :  { %4027 = vmatpush3.bf16.msra.mxu1 %v4596_v3 }
 0x3bd   :  { %4028 = vmatprep.subr.bf16.mxu1 %v4708_v38 }
 0x3c0   :  { %4029 = vmatpush3.bf16.msra.mxu1 %v4597_v0 }
 0x3c1   :  { %4030 = vmatprep.subr.bf16.mxu1 %v4708_v38 }
 0x3c4   :  { %4031 = vmatpush3.bf16.msra.mxu1 %v4598_v20 }
 0x3c5   :  { %4032 = vmatprep.subr.bf16.mxu1 %v4708_v38 }
 0x3c8   :  { %4033 = vmatpush3.bf16.msra.mxu1 %v4599_v5 }
 0x3c9   :  { %4034 = vmatprep.subr.bf16.mxu1 %v4708_v38 }
 0x3cc   :  { %4035 = vmatpush3.bf16.msra.mxu1 %v4600_v6 }
 0x3cf   :  { %4037 = vmatmul.mubr.bf16.vlgmr.msra.gmra.mrb[40].mxu1 %v3251_v8 }
 0x482   :  { %v4005_v9 = vpop.f32.mrb[36].mxu1 }
 0x483   :  { %v4006_v12 = vpop.f32.mrb[37].mxu1 }
 0x484   :  { %v4007_v13 = vadd.f32 %v4006_v12, %v4005_v9  ;;  %v4008_v16 = vpop.f32.mrb[38].mxu1 }
 0x485   :  { %v4009_v17 = vpop.f32.mrb[39].mxu1 }
 0x486   :  { %v3486_v19 = vadd.f32 %v4007_v13, %v3920_v18 }
 0x4a2   :  { %v3525_v56 = vpop.f32.mrb[40].mxu1 }
 0x4a3   :  { %v3526_v21 = vadd.f32 %v3525_v56, %v3486_v19  ;;  %v4038_v60 = vpop.f32.mrb[41].mxu1 }
 0x4a4   :  { %v3528_v23 = vpop.f32.mrb[42].mxu1 }
 0x4a5   :  { %v3531_v11 = vpack.c.bf16 %v3526_v21, %v3526_v21  ;;  %v4039_v24 = vpop.f32.mrb[43].mxu1 }
 0x4a7   :  { %3532 = vst [vmem:[%s4961_s11] sm:$0xf] %v3531_v11 }
 0x4a8   :  { %3537 = vsyncpa [#allocation3], 1 }
 0x4a9   :  { %3538 = vsyncpa [#allocation5], 1 }
 0x4aa   :  { %3539 = vsyncpa [#allocation8], 1 }

</bundles_post_ra>
